<compile_context>
chip_gen: v7x
topology: tpu7x:2x2x1
jax: 0.10.0
libtpu: 0.0.40
codegen_flags: <defaults>
</compile_context>

<pallas_src>
import functools
import numpy as np

import jax
import jax.numpy as jnp
from jax.experimental import pallas as pl
from jax.experimental.pallas import tpu as pltpu

NEG_SLOPE = 0.01   # nn.LeakyReLU default negative_slope
SUBLANE = 8        # f32 sublane tile
LANE = 128         # lane tile


def _round_up(x, m):
    return (x + m - 1) // m * m


def _lstm_mlp_kernel(num_layers, hidden_units, T, Bp,
                     x_ref, h0_ref, c0_ref, *refs):
    """All LSTM timestep math + MLP runs inside this kernel.

    refs layout:
      [wih_0, whh_0, b_0, ..., wih_{L-1}, whh_{L-1}, b_{L-1},
       mlp_w1, mlp_b1, mlp_w2, mlp_b2,
       out_ref, hn_ref, cn_ref,                         # outputs
       seq_scratch (T, Bp, H), gx_scratch (T, Bp, 4H)]  # VMEM scratch
    """
    n_w = 3 * num_layers
    layer_ws = refs[:n_w]
    w1_ref, b1_ref, w2_ref, b2_ref = refs[n_w:n_w + 4]
    out_ref, hn_ref, cn_ref = refs[n_w + 4:n_w + 7]
    seq_ref, gx_ref = refs[n_w + 7:n_w + 9]

    H = hidden_units

    for layer in range(num_layers):
        wih = layer_ws[3 * layer][...]       # (in_l, 4H)   pre-transposed
        whh = layer_ws[3 * layer + 1][...]   # (H, 4H)      pre-transposed
        b = layer_ws[3 * layer + 2][...]     # (1, 4H)      bias_ih + bias_hh

        # ---- Hoisted input projection: one matmul covers all T steps ----
        # Layer 0 input is x (T, Bp, I); layer l>0 input is the previous
        # layer's sequence output already sitting in seq_ref (T, Bp, H).
        # Bp == 8 makes the leading-dim collapse a layout-preserving reshape.
        if layer == 0:
            layer_in = x_ref[...].reshape(T * Bp, x_ref.shape[2])
        else:
            layer_in = seq_ref[...].reshape(T * Bp, H)
        gx = jnp.dot(layer_in, wih, preferred_element_type=jnp.float32) + b
        gx_ref[...] = gx.reshape(T, Bp, 4 * H)

        h = h0_ref[layer]                    # (Bp, H)
        c = c0_ref[layer]                    # (Bp, H)

        # ---- Recurrence: fully unrolled, aligned whole-tile ref[t] access ----
        # (Pinning whh via pltpu.matmul_push_rhs/matmul_acc_lhs/matmul_pop would
        #  avoid re-pushing the RHS each step; kept as jnp.dot for portability.)
        for t in range(T):
            gates = (jnp.dot(h, whh, preferred_element_type=jnp.float32)
                     + gx_ref[t])                       # (Bp, 4H), 4H == 128 lanes
            # Two full-vreg transcendentals, then static lane slices in
            # PyTorch gate order i, f, g, o.
            sig = jax.nn.sigmoid(gates)
            tnh = jnp.tanh(gates)
            i_g = sig[:, 0 * H:1 * H]
            f_g = sig[:, 1 * H:2 * H]
            g_g = tnh[:, 2 * H:3 * H]
            o_g = sig[:, 3 * H:4 * H]
            c = f_g * c + i_g * g_g
            h = o_g * jnp.tanh(c)
            seq_ref[t] = h                              # aligned whole-tile store

        hn_ref[layer] = h
        cn_ref[layer] = c

    # ---- MLP over every timestep of the top-layer LSTM output ----
    feats = seq_ref[...].reshape(T * Bp, H)             # layout-preserving
    hid = (jnp.dot(feats, w1_ref[...], preferred_element_type=jnp.float32)
           + b1_ref[...])
    hid = jnp.where(hid >= 0, hid, NEG_SLOPE * hid)     # LeakyReLU(0.01)
    out_ref[...] = (jnp.dot(hid, w2_ref[...],
                            preferred_element_type=jnp.float32) + b2_ref[...])


def shallow_regression_lstm_decode(x, hidden, layer_params, mlp_params,
                                   *, hidden_units):
    """x: (B, T, num_sensors) f32, hidden = (h0, c0) each (L, B, H).

    layer_params: list of (wih_T (in_l,4H), whh_T (H,4H), bias (1,4H)).
    mlp_params:   (w1_T (H,M), b1 (1,M), w2_T (M,S), b2 (1,S)).
    Returns (outn (B,T,S), (h_n (L,B,H), c_n (L,B,H))).
    """
    h0, c0 = hidden
    B, T, I = x.shape
    L = len(layer_params)
    H = hidden_units
    M = mlp_params[0].shape[1]
    S = mlp_params[2].shape[1]

    Bp = _round_up(max(B, SUBLANE), SUBLANE)   # batch -> full sublane tile
    Mp = _round_up(M, LANE)                    # MLP hidden -> lane-dense
    Sp = _round_up(S, LANE)                    # output -> lane-dense

    # Time-major layout, batch zero-padded (padded rows are sliced off below).
    x_tm = jnp.transpose(x, (1, 0, 2)).astype(jnp.float32)          # (T, B, I)
    x_tm = jnp.pad(x_tm, ((0, 0), (0, Bp - B), (0, 0)))
    h0p = jnp.pad(h0.astype(jnp.float32), ((0, 0), (0, Bp - B), (0, 0)))
    c0p = jnp.pad(c0.astype(jnp.float32), ((0, 0), (0, Bp - B), (0, 0)))

    # Lane-dense MLP weights: zero-pad hidden (M) and output (S) lanes to 128.
    # Exact: padded hidden columns produce 0 -> LeakyReLU(0)=0 -> contribute 0.
    w1, b1, w2, b2 = mlp_params
    w1p = jnp.pad(w1.astype(jnp.float32), ((0, 0), (0, Mp - M)))
    b1p = jnp.pad(b1.astype(jnp.float32), ((0, 0), (0, Mp - M)))
    w2p = jnp.pad(w2.astype(jnp.float32), ((0, Mp - M), (0, Sp - S)))
    b2p = jnp.pad(b2.astype(jnp.float32), ((0, 0), (0, Sp - S)))

    flat_weights = [jnp.asarray(w, jnp.float32)
                    for lp in layer_params for w in lp]
    flat_weights += [w1p, b1p, w2p, b2p]
    inputs = [x_tm, h0p, c0p] + flat_weights

    vmem = pl.BlockSpec(memory_space=pltpu.MemorySpace.VMEM)
    kernel = functools.partial(_lstm_mlp_kernel, L, H, T, Bp)

    out_flat, h_n, c_n = pl.pallas_call(
        kernel,
        out_shape=(
            jax.ShapeDtypeStruct((T * Bp, Sp), jnp.float32),
            jax.ShapeDtypeStruct((L, Bp, H), jnp.float32),
            jax.ShapeDtypeStruct((L, Bp, H), jnp.float32),
        ),
        in_specs=[vmem] * len(inputs),
        out_specs=(vmem, vmem, vmem),
        scratch_shapes=[
            pltpu.VMEM((T, Bp, H), jnp.float32),       # per-layer seq output
            pltpu.VMEM((T, Bp, 4 * H), jnp.float32),   # hoisted x-projection
        ],
        compiler_params=pltpu.CompilerParams(
            vmem_limit_bytes=32 * 1024 * 1024),
    )(*inputs)

    # Un-pad and return batch-first.
    outn = out_flat.reshape(T, Bp, Sp)[:, :B, :S].transpose(1, 0, 2)
    return outn, (h_n[:, :B], c_n[:, :B])


def _reference(x, hidden, layer_params, mlp_params):
    """Pure-JAX reference with identical semantics (for sanity check)."""
    h0, c0 = hidden
    seq = jnp.transpose(x, (1, 0, 2))
    T = seq.shape[0]
    hs, cs = [], []
    for l, (wih, whh, b) in enumerate(layer_params):
        h, c = h0[l], c0[l]
        H = h.shape[-1]
        outs = []
        for t in range(T):
            g = seq[t] @ wih + h @ whh + b
            i_g = jax.nn.sigmoid(g[:, :H])
            f_g = jax.nn.sigmoid(g[:, H:2 * H])
            g_g = jnp.tanh(g[:, 2 * H:3 * H])
            o_g = jax.nn.sigmoid(g[:, 3 * H:])
            c = f_g * c + i_g * g_g
            h = o_g * jnp.tanh(c)
            outs.append(h)
        seq = jnp.stack(outs, 0)
        hs.append(h)
        cs.append(c)
    w1, b1, w2, b2 = mlp_params
    m = seq @ w1 + b1
    m = jnp.where(m >= 0, m, NEG_SLOPE * m)
    o = m @ w2 + b2
    return jnp.transpose(o, (1, 0, 2)), (jnp.stack(hs), jnp.stack(cs))


if __name__ == "__main__":
    # Module hyperparameters (small, consistent with the forward pass).
    num_sensors = 4      # LSTM input size and MLP output size
    hidden_units = 32
    num_layers = 2
    mlp_units = 16
    B, T = 2, 8

    key = jax.random.PRNGKey(0)
    keys = iter(jax.random.split(key, 64))
    bound = 1.0 / np.sqrt(hidden_units)   # PyTorch default LSTM init range

    def u(shape, b=bound):
        return jax.random.uniform(next(keys), shape, jnp.float32, -b, b)

    # LSTM parameters (PyTorch layout: weight_ih (4H, in), weight_hh (4H, H),
    # bias_ih (4H,), bias_hh (4H,)); pre-transpose + fuse biases for the kernel.
    layer_params = []
    for l in range(num_layers):
        in_l = num_sensors if l == 0 else hidden_units
        w_ih = u((4 * hidden_units, in_l))
        w_hh = u((4 * hidden_units, hidden_units))
        b_ih = u((4 * hidden_units,))
        b_hh = u((4 * hidden_units,))
        layer_params.append((w_ih.T, w_hh.T, (b_ih + b_hh).reshape(1, -1)))

    # MLP parameters: Linear(H, M), LeakyReLU, Linear(M, S).
    b1r = 1.0 / np.sqrt(hidden_units)
    b2r = 1.0 / np.sqrt(mlp_units)
    w1 = u((mlp_units, hidden_units), b1r)
    b1 = u((mlp_units,), b1r)
    w2 = u((num_sensors, mlp_units), b2r)
    b2 = u((num_sensors,), b2r)
    mlp_params = (w1.T, b1.reshape(1, -1), w2.T, b2.reshape(1, -1))

    # Inputs.
    x = jax.random.normal(next(keys), (B, T, num_sensors), jnp.float32)
    h0 = jax.random.normal(next(keys), (num_layers, B, hidden_units), jnp.float32)
    c0 = jax.random.normal(next(keys), (num_layers, B, hidden_units), jnp.float32)

    outn, (h_n, c_n) = shallow_regression_lstm_decode(
        x, (h0, c0), layer_params, mlp_params, hidden_units=hidden_units)
    jax.block_until_ready((outn, h_n, c_n))

    # Sanity check against pure-JAX reference.
    ref_out, (ref_h, ref_c) = _reference(x, (h0, c0), layer_params, mlp_params)
    np.testing.assert_allclose(np.asarray(outn), np.asarray(ref_out), rtol=1e-5, atol=1e-5)
    np.testing.assert_allclose(np.asarray(h_n), np.asarray(ref_h), rtol=1e-5, atol=1e-5)
    np.testing.assert_allclose(np.asarray(c_n), np.asarray(ref_c), rtol=1e-5, atol=1e-5)

    print("KERNEL_OK")
</pallas_src>

<mosaic_0001>
module attributes {stable_mosaic.version = 11 : i64} {
  func.func @_lstm_mlp_kernel(%arg0: memref<8x8x4xf32, #tpu.memory_space<vmem>>, %arg1: memref<2x8x32xf32, #tpu.memory_space<vmem>>, %arg2: memref<2x8x32xf32, #tpu.memory_space<vmem>>, %arg3: memref<4x128xf32, #tpu.memory_space<vmem>>, %arg4: memref<32x128xf32, #tpu.memory_space<vmem>>, %arg5: memref<1x128xf32, #tpu.memory_space<vmem>>, %arg6: memref<32x128xf32, #tpu.memory_space<vmem>>, %arg7: memref<32x128xf32, #tpu.memory_space<vmem>>, %arg8: memref<1x128xf32, #tpu.memory_space<vmem>>, %arg9: memref<32x128xf32, #tpu.memory_space<vmem>>, %arg10: memref<1x128xf32, #tpu.memory_space<vmem>>, %arg11: memref<128x128xf32, #tpu.memory_space<vmem>>, %arg12: memref<1x128xf32, #tpu.memory_space<vmem>>, %arg13: memref<64x128xf32, #tpu.memory_space<vmem>>, %arg14: memref<2x8x32xf32, #tpu.memory_space<vmem>>, %arg15: memref<2x8x32xf32, #tpu.memory_space<vmem>>, %arg16: memref<8x8x32xf32, #tpu.memory_space<vmem>>, %arg17: memref<8x8x128xf32, #tpu.memory_space<vmem>>) attributes {dimension_semantics = [], scalar_prefetch = 0 : i64, scratch_operands = 2 : i64, tpu.core_type = #tpu.core_type<tc>} {
    %c0 = arith.constant 0 : index
    %c0_0 = arith.constant 0 : index
    %0 = vector.load %arg3[%c0, %c0_0] : memref<4x128xf32, #tpu.memory_space<vmem>>, vector<4x128xf32>
    %c0_1 = arith.constant 0 : index
    %c0_2 = arith.constant 0 : index
    %1 = vector.load %arg4[%c0_1, %c0_2] : memref<32x128xf32, #tpu.memory_space<vmem>>, vector<32x128xf32>
    %c0_3 = arith.constant 0 : index
    %c0_4 = arith.constant 0 : index
    %2 = vector.load %arg5[%c0_3, %c0_4] : memref<1x128xf32, #tpu.memory_space<vmem>>, vector<1x128xf32>
    %c0_5 = arith.constant 0 : index
    %c0_6 = arith.constant 0 : index
    %c0_7 = arith.constant 0 : index
    %3 = vector.load %arg0[%c0_5, %c0_6, %c0_7] : memref<8x8x4xf32, #tpu.memory_space<vmem>>, vector<8x8x4xf32>
    %4 = vector.shape_cast %3 : vector<8x8x4xf32> to vector<64x4xf32>
    %cst = arith.constant dense<0.000000e+00> : vector<64x128xf32>
    %5 = tpu.matmul %4, %0, %cst {dimension_numbers = #tpu.dot_dimension_numbers<[1], [0], [0], [1], [0, 0, 1, 1], [], []>} : vector<64x4xf32>, vector<4x128xf32>, vector<64x128xf32> -> vector<64x128xf32>
    %6 = vector.broadcast %2 : vector<1x128xf32> to vector<64x128xf32>
    %7 = arith.addf %5, %6 : vector<64x128xf32>
    %8 = vector.shape_cast %7 : vector<64x128xf32> to vector<8x8x128xf32>
    %c0_8 = arith.constant 0 : index
    %c0_9 = arith.constant 0 : index
    %c0_10 = arith.constant 0 : index
    %9 = vector.load %arg17[%c0_8, %c0_9, %c0_10] : memref<8x8x128xf32, #tpu.memory_space<vmem>>, vector<8x8x128xf32>
    tpu.vector_store %arg17[%c0_8, %c0_9, %c0_10], %8 {strides = array<i32>} : memref<8x8x128xf32, #tpu.memory_space<vmem>>, vector<8x8x128xf32>,
    %c0_11 = arith.constant 0 : index
    %c0_12 = arith.constant 0 : index
    %c0_13 = arith.constant 0 : index
    %10 = vector.load %arg1[%c0_11, %c0_12, %c0_13] : memref<2x8x32xf32, #tpu.memory_space<vmem>>, vector<1x8x32xf32>
    %11 = vector.shape_cast %10 : vector<1x8x32xf32> to vector<8x32xf32>
    %c0_14 = arith.constant 0 : index
    %c0_15 = arith.constant 0 : index
    %c0_16 = arith.constant 0 : index
    %12 = vector.load %arg2[%c0_14, %c0_15, %c0_16] : memref<2x8x32xf32, #tpu.memory_space<vmem>>, vector<1x8x32xf32>
    %13 = vector.shape_cast %12 : vector<1x8x32xf32> to vector<8x32xf32>
    %cst_17 = arith.constant dense<0.000000e+00> : vector<8x128xf32>
    %14 = tpu.matmul %11, %1, %cst_17 {dimension_numbers = #tpu.dot_dimension_numbers<[1], [0], [0], [1], [0, 0, 1, 1], [], []>} : vector<8x32xf32>, vector<32x128xf32>, vector<8x128xf32> -> vector<8x128xf32>
    %c0_18 = arith.constant 0 : index
    %c0_19 = arith.constant 0 : index
    %c0_20 = arith.constant 0 : index
    %15 = vector.load %arg17[%c0_18, %c0_19, %c0_20] : memref<8x8x128xf32, #tpu.memory_space<vmem>>, vector<1x8x128xf32>
    %16 = vector.shape_cast %15 : vector<1x8x128xf32> to vector<8x128xf32>
    %17 = arith.addf %14, %16 : vector<8x128xf32>
    %18 = arith.negf %17 : vector<8x128xf32>
    %19 = math.exp %18 : vector<8x128xf32>
    %cst_21 = arith.constant 1.000000e+00 : f32
    %20 = vector.broadcast %cst_21 : f32 to vector<8x128xf32>
    %21 = arith.addf %20, %19 : vector<8x128xf32>
    %22 = arith.divf %20, %21 : vector<8x128xf32>
    %23 = math.tanh %17 : vector<8x128xf32>
    %24 = vector.extract_strided_slice %22 {offsets = [0, 0], sizes = [8, 32], strides = [1, 1]} : vector<8x128xf32> to vector<8x32xf32>
    %25 = vector.extract_strided_slice %22 {offsets = [0, 32], sizes = [8, 32], strides = [1, 1]} : vector<8x128xf32> to vector<8x32xf32>
    %26 = vector.extract_strided_slice %23 {offsets = [0, 64], sizes = [8, 32], strides = [1, 1]} : vector<8x128xf32> to vector<8x32xf32>
    %27 = vector.extract_strided_slice %22 {offsets = [0, 96], sizes = [8, 32], strides = [1, 1]} : vector<8x128xf32> to vector<8x32xf32>
    %28 = arith.mulf %25, %13 : vector<8x32xf32>
    %29 = arith.mulf %24, %26 : vector<8x32xf32>
    %30 = arith.addf %28, %29 : vector<8x32xf32>
    %31 = math.tanh %30 : vector<8x32xf32>
    %32 = arith.mulf %27, %31 : vector<8x32xf32>
    %c0_22 = arith.constant 0 : index
    %c0_23 = arith.constant 0 : index
    %c0_24 = arith.constant 0 : index
    %33 = vector.load %arg16[%c0_22, %c0_23, %c0_24] : memref<8x8x32xf32, #tpu.memory_space<vmem>>, vector<1x8x32xf32>
    %34 = vector.shape_cast %33 : vector<1x8x32xf32> to vector<8x32xf32>
    %35 = vector.shape_cast %32 : vector<8x32xf32> to vector<1x8x32xf32>
    tpu.vector_store %arg16[%c0_22, %c0_23, %c0_24], %35 {strides = array<i32>} : memref<8x8x32xf32, #tpu.memory_space<vmem>>, vector<1x8x32xf32>,
    %cst_25 = arith.constant dense<0.000000e+00> : vector<8x128xf32>
    %36 = tpu.matmul %32, %1, %cst_25 {dimension_numbers = #tpu.dot_dimension_numbers<[1], [0], [0], [1], [0, 0, 1, 1], [], []>} : vector<8x32xf32>, vector<32x128xf32>, vector<8x128xf32> -> vector<8x128xf32>
    %c1 = arith.constant 1 : index
    %c0_26 = arith.constant 0 : index
    %c0_27 = arith.constant 0 : index
    %37 = vector.load %arg17[%c1, %c0_26, %c0_27] : memref<8x8x128xf32, #tpu.memory_space<vmem>>, vector<1x8x128xf32>
    %38 = vector.shape_cast %37 : vector<1x8x128xf32> to vector<8x128xf32>
    %39 = arith.addf %36, %38 : vector<8x128xf32>
    %40 = arith.negf %39 : vector<8x128xf32>
    %41 = math.exp %40 : vector<8x128xf32>
    %cst_28 = arith.constant 1.000000e+00 : f32
    %42 = vector.broadcast %cst_28 : f32 to vector<8x128xf32>
    %43 = arith.addf %42, %41 : vector<8x128xf32>
    %44 = arith.divf %42, %43 : vector<8x128xf32>
    %45 = math.tanh %39 : vector<8x128xf32>
    %46 = vector.extract_strided_slice %44 {offsets = [0, 0], sizes = [8, 32], strides = [1, 1]} : vector<8x128xf32> to vector<8x32xf32>
    %47 = vector.extract_strided_slice %44 {offsets = [0, 32], sizes = [8, 32], strides = [1, 1]} : vector<8x128xf32> to vector<8x32xf32>
    %48 = vector.extract_strided_slice %45 {offsets = [0, 64], sizes = [8, 32], strides = [1, 1]} : vector<8x128xf32> to vector<8x32xf32>
    %49 = vector.extract_strided_slice %44 {offsets = [0, 96], sizes = [8, 32], strides = [1, 1]} : vector<8x128xf32> to vector<8x32xf32>
    %50 = arith.mulf %47, %30 : vector<8x32xf32>
    %51 = arith.mulf %46, %48 : vector<8x32xf32>
    %52 = arith.addf %50, %51 : vector<8x32xf32>
    %53 = math.tanh %52 : vector<8x32xf32>
    %54 = arith.mulf %49, %53 : vector<8x32xf32>
    %c1_29 = arith.constant 1 : index
    %c0_30 = arith.constant 0 : index
    %c0_31 = arith.constant 0 : index
    %55 = vector.load %arg16[%c1_29, %c0_30, %c0_31] : memref<8x8x32xf32, #tpu.memory_space<vmem>>, vector<1x8x32xf32>
    %56 = vector.shape_cast %55 : vector<1x8x32xf32> to vector<8x32xf32>
    %57 = vector.shape_cast %54 : vector<8x32xf32> to vector<1x8x32xf32>
    tpu.vector_store %arg16[%c1_29, %c0_30, %c0_31], %57 {strides = array<i32>} : memref<8x8x32xf32, #tpu.memory_space<vmem>>, vector<1x8x32xf32>,
    %cst_32 = arith.constant dense<0.000000e+00> : vector<8x128xf32>
    %58 = tpu.matmul %54, %1, %cst_32 {dimension_numbers = #tpu.dot_dimension_numbers<[1], [0], [0], [1], [0, 0, 1, 1], [], []>} : vector<8x32xf32>, vector<32x128xf32>, vector<8x128xf32> -> vector<8x128xf32>
    %c2 = arith.constant 2 : index
    %c0_33 = arith.constant 0 : index
    %c0_34 = arith.constant 0 : index
    %59 = vector.load %arg17[%c2, %c0_33, %c0_34] : memref<8x8x128xf32, #tpu.memory_space<vmem>>, vector<1x8x128xf32>
    %60 = vector.shape_cast %59 : vector<1x8x128xf32> to vector<8x128xf32>
    %61 = arith.addf %58, %60 : vector<8x128xf32>
    %62 = arith.negf %61 : vector<8x128xf32>
    %63 = math.exp %62 : vector<8x128xf32>
    %cst_35 = arith.constant 1.000000e+00 : f32
    %64 = vector.broadcast %cst_35 : f32 to vector<8x128xf32>
    %65 = arith.addf %64, %63 : vector<8x128xf32>
    %66 = arith.divf %64, %65 : vector<8x128xf32>
    %67 = math.tanh %61 : vector<8x128xf32>
    %68 = vector.extract_strided_slice %66 {offsets = [0, 0], sizes = [8, 32], strides = [1, 1]} : vector<8x128xf32> to vector<8x32xf32>
    %69 = vector.extract_strided_slice %66 {offsets = [0, 32], sizes = [8, 32], strides = [1, 1]} : vector<8x128xf32> to vector<8x32xf32>
    %70 = vector.extract_strided_slice %67 {offsets = [0, 64], sizes = [8, 32], strides = [1, 1]} : vector<8x128xf32> to vector<8x32xf32>
    %71 = vector.extract_strided_slice %66 {offsets = [0, 96], sizes = [8, 32], strides = [1, 1]} : vector<8x128xf32> to vector<8x32xf32>
    %72 = arith.mulf %69, %52 : vector<8x32xf32>
    %73 = arith.mulf %68, %70 : vector<8x32xf32>
    %74 = arith.addf %72, %73 : vector<8x32xf32>
    %75 = math.tanh %74 : vector<8x32xf32>
    %76 = arith.mulf %71, %75 : vector<8x32xf32>
    %c2_36 = arith.constant 2 : index
    %c0_37 = arith.constant 0 : index
    %c0_38 = arith.constant 0 : index
    %77 = vector.load %arg16[%c2_36, %c0_37, %c0_38] : memref<8x8x32xf32, #tpu.memory_space<vmem>>, vector<1x8x32xf32>
    %78 = vector.shape_cast %77 : vector<1x8x32xf32> to vector<8x32xf32>
    %79 = vector.shape_cast %76 : vector<8x32xf32> to vector<1x8x32xf32>
    tpu.vector_store %arg16[%c2_36, %c0_37, %c0_38], %79 {strides = array<i32>} : memref<8x8x32xf32, #tpu.memory_space<vmem>>, vector<1x8x32xf32>,
    %cst_39 = arith.constant dense<0.000000e+00> : vector<8x128xf32>
    %80 = tpu.matmul %76, %1, %cst_39 {dimension_numbers = #tpu.dot_dimension_numbers<[1], [0], [0], [1], [0, 0, 1, 1], [], []>} : vector<8x32xf32>, vector<32x128xf32>, vector<8x128xf32> -> vector<8x128xf32>
    %c3 = arith.constant 3 : index
    %c0_40 = arith.constant 0 : index
    %c0_41 = arith.constant 0 : index
    %81 = vector.load %arg17[%c3, %c0_40, %c0_41] : memref<8x8x128xf32, #tpu.memory_space<vmem>>, vector<1x8x128xf32>
    %82 = vector.shape_cast %81 : vector<1x8x128xf32> to vector<8x128xf32>
    %83 = arith.addf %80, %82 : vector<8x128xf32>
    %84 = arith.negf %83 : vector<8x128xf32>
    %85 = math.exp %84 : vector<8x128xf32>
    %cst_42 = arith.constant 1.000000e+00 : f32
    %86 = vector.broadcast %cst_42 : f32 to vector<8x128xf32>
    %87 = arith.addf %86, %85 : vector<8x128xf32>
    %88 = arith.divf %86, %87 : vector<8x128xf32>
    %89 = math.tanh %83 : vector<8x128xf32>
    %90 = vector.extract_strided_slice %88 {offsets = [0, 0], sizes = [8, 32], strides = [1, 1]} : vector<8x128xf32> to vector<8x32xf32>
    %91 = vector.extract_strided_slice %88 {offsets = [0, 32], sizes = [8, 32], strides = [1, 1]} : vector<8x128xf32> to vector<8x32xf32>
    %92 = vector.extract_strided_slice %89 {offsets = [0, 64], sizes = [8, 32], strides = [1, 1]} : vector<8x128xf32> to vector<8x32xf32>
    %93 = vector.extract_strided_slice %88 {offsets = [0, 96], sizes = [8, 32], strides = [1, 1]} : vector<8x128xf32> to vector<8x32xf32>
    %94 = arith.mulf %91, %74 : vector<8x32xf32>
    %95 = arith.mulf %90, %92 : vector<8x32xf32>
    %96 = arith.addf %94, %95 : vector<8x32xf32>
    %97 = math.tanh %96 : vector<8x32xf32>
    %98 = arith.mulf %93, %97 : vector<8x32xf32>
    %c3_43 = arith.constant 3 : index
    %c0_44 = arith.constant 0 : index
    %c0_45 = arith.constant 0 : index
    %99 = vector.load %arg16[%c3_43, %c0_44, %c0_45] : memref<8x8x32xf32, #tpu.memory_space<vmem>>, vector<1x8x32xf32>
    %100 = vector.shape_cast %99 : vector<1x8x32xf32> to vector<8x32xf32>
    %101 = vector.shape_cast %98 : vector<8x32xf32> to vector<1x8x32xf32>
    tpu.vector_store %arg16[%c3_43, %c0_44, %c0_45], %101 {strides = array<i32>} : memref<8x8x32xf32, #tpu.memory_space<vmem>>, vector<1x8x32xf32>,
    %cst_46 = arith.constant dense<0.000000e+00> : vector<8x128xf32>
    %102 = tpu.matmul %98, %1, %cst_46 {dimension_numbers = #tpu.dot_dimension_numbers<[1], [0], [0], [1], [0, 0, 1, 1], [], []>} : vector<8x32xf32>, vector<32x128xf32>, vector<8x128xf32> -> vector<8x128xf32>
    %c4 = arith.constant 4 : index
    %c0_47 = arith.constant 0 : index
    %c0_48 = arith.constant 0 : index
    %103 = vector.load %arg17[%c4, %c0_47, %c0_48] : memref<8x8x128xf32, #tpu.memory_space<vmem>>, vector<1x8x128xf32>
    %104 = vector.shape_cast %103 : vector<1x8x128xf32> to vector<8x128xf32>
    %105 = arith.addf %102, %104 : vector<8x128xf32>
    %106 = arith.negf %105 : vector<8x128xf32>
    %107 = math.exp %106 : vector<8x128xf32>
    %cst_49 = arith.constant 1.000000e+00 : f32
    %108 = vector.broadcast %cst_49 : f32 to vector<8x128xf32>
    %109 = arith.addf %108, %107 : vector<8x128xf32>
    %110 = arith.divf %108, %109 : vector<8x128xf32>
    %111 = math.tanh %105 : vector<8x128xf32>
    %112 = vector.extract_strided_slice %110 {offsets = [0, 0], sizes = [8, 32], strides = [1, 1]} : vector<8x128xf32> to vector<8x32xf32>
    %113 = vector.extract_strided_slice %110 {offsets = [0, 32], sizes = [8, 32], strides = [1, 1]} : vector<8x128xf32> to vector<8x32xf32>
    %114 = vector.extract_strided_slice %111 {offsets = [0, 64], sizes = [8, 32], strides = [1, 1]} : vector<8x128xf32> to vector<8x32xf32>
    %115 = vector.extract_strided_slice %110 {offsets = [0, 96], sizes = [8, 32], strides = [1, 1]} : vector<8x128xf32> to vector<8x32xf32>
    %116 = arith.mulf %113, %96 : vector<8x32xf32>
    %117 = arith.mulf %112, %114 : vector<8x32xf32>
    %118 = arith.addf %116, %117 : vector<8x32xf32>
    %119 = math.tanh %118 : vector<8x32xf32>
    %120 = arith.mulf %115, %119 : vector<8x32xf32>
    %c4_50 = arith.constant 4 : index
    %c0_51 = arith.constant 0 : index
    %c0_52 = arith.constant 0 : index
    %121 = vector.load %arg16[%c4_50, %c0_51, %c0_52] : memref<8x8x32xf32, #tpu.memory_space<vmem>>, vector<1x8x32xf32>
    %122 = vector.shape_cast %121 : vector<1x8x32xf32> to vector<8x32xf32>
    %123 = vector.shape_cast %120 : vector<8x32xf32> to vector<1x8x32xf32>
    tpu.vector_store %arg16[%c4_50, %c0_51, %c0_52], %123 {strides = array<i32>} : memref<8x8x32xf32, #tpu.memory_space<vmem>>, vector<1x8x32xf32>,
    %cst_53 = arith.constant dense<0.000000e+00> : vector<8x128xf32>
    %124 = tpu.matmul %120, %1, %cst_53 {dimension_numbers = #tpu.dot_dimension_numbers<[1], [0], [0], [1], [0, 0, 1, 1], [], []>} : vector<8x32xf32>, vector<32x128xf32>, vector<8x128xf32> -> vector<8x128xf32>
    %c5 = arith.constant 5 : index
    %c0_54 = arith.constant 0 : index
    %c0_55 = arith.constant 0 : index
    %125 = vector.load %arg17[%c5, %c0_54, %c0_55] : memref<8x8x128xf32, #tpu.memory_space<vmem>>, vector<1x8x128xf32>
    %126 = vector.shape_cast %125 : vector<1x8x128xf32> to vector<8x128xf32>
    %127 = arith.addf %124, %126 : vector<8x128xf32>
    %128 = arith.negf %127 : vector<8x128xf32>
    %129 = math.exp %128 : vector<8x128xf32>
    %cst_56 = arith.constant 1.000000e+00 : f32
    %130 = vector.broadcast %cst_56 : f32 to vector<8x128xf32>
    %131 = arith.addf %130, %129 : vector<8x128xf32>
    %132 = arith.divf %130, %131 : vector<8x128xf32>
    %133 = math.tanh %127 : vector<8x128xf32>
    %134 = vector.extract_strided_slice %132 {offsets = [0, 0], sizes = [8, 32], strides = [1, 1]} : vector<8x128xf32> to vector<8x32xf32>
    %135 = vector.extract_strided_slice %132 {offsets = [0, 32], sizes = [8, 32], strides = [1, 1]} : vector<8x128xf32> to vector<8x32xf32>
    %136 = vector.extract_strided_slice %133 {offsets = [0, 64], sizes = [8, 32], strides = [1, 1]} : vector<8x128xf32> to vector<8x32xf32>
    %137 = vector.extract_strided_slice %132 {offsets = [0, 96], sizes = [8, 32], strides = [1, 1]} : vector<8x128xf32> to vector<8x32xf32>
    %138 = arith.mulf %135, %118 : vector<8x32xf32>
    %139 = arith.mulf %134, %136 : vector<8x32xf32>
    %140 = arith.addf %138, %139 : vector<8x32xf32>
    %141 = math.tanh %140 : vector<8x32xf32>
    %142 = arith.mulf %137, %141 : vector<8x32xf32>
    %c5_57 = arith.constant 5 : index
    %c0_58 = arith.constant 0 : index
    %c0_59 = arith.constant 0 : index
    %143 = vector.load %arg16[%c5_57, %c0_58, %c0_59] : memref<8x8x32xf32, #tpu.memory_space<vmem>>, vector<1x8x32xf32>
    %144 = vector.shape_cast %143 : vector<1x8x32xf32> to vector<8x32xf32>
    %145 = vector.shape_cast %142 : vector<8x32xf32> to vector<1x8x32xf32>
    tpu.vector_store %arg16[%c5_57, %c0_58, %c0_59], %145 {strides = array<i32>} : memref<8x8x32xf32, #tpu.memory_space<vmem>>, vector<1x8x32xf32>,
    %cst_60 = arith.constant dense<0.000000e+00> : vector<8x128xf32>
    %146 = tpu.matmul %142, %1, %cst_60 {dimension_numbers = #tpu.dot_dimension_numbers<[1], [0], [0], [1], [0, 0, 1, 1], [], []>} : vector<8x32xf32>, vector<32x128xf32>, vector<8x128xf32> -> vector<8x128xf32>
    %c6 = arith.constant 6 : index
    %c0_61 = arith.constant 0 : index
    %c0_62 = arith.constant 0 : index
    %147 = vector.load %arg17[%c6, %c0_61, %c0_62] : memref<8x8x128xf32, #tpu.memory_space<vmem>>, vector<1x8x128xf32>
    %148 = vector.shape_cast %147 : vector<1x8x128xf32> to vector<8x128xf32>
    %149 = arith.addf %146, %148 : vector<8x128xf32>
    %150 = arith.negf %149 : vector<8x128xf32>
    %151 = math.exp %150 : vector<8x128xf32>
    %cst_63 = arith.constant 1.000000e+00 : f32
    %152 = vector.broadcast %cst_63 : f32 to vector<8x128xf32>
    %153 = arith.addf %152, %151 : vector<8x128xf32>
    %154 = arith.divf %152, %153 : vector<8x128xf32>
    %155 = math.tanh %149 : vector<8x128xf32>
    %156 = vector.extract_strided_slice %154 {offsets = [0, 0], sizes = [8, 32], strides = [1, 1]} : vector<8x128xf32> to vector<8x32xf32>
    %157 = vector.extract_strided_slice %154 {offsets = [0, 32], sizes = [8, 32], strides = [1, 1]} : vector<8x128xf32> to vector<8x32xf32>
    %158 = vector.extract_strided_slice %155 {offsets = [0, 64], sizes = [8, 32], strides = [1, 1]} : vector<8x128xf32> to vector<8x32xf32>
    %159 = vector.extract_strided_slice %154 {offsets = [0, 96], sizes = [8, 32], strides = [1, 1]} : vector<8x128xf32> to vector<8x32xf32>
    %160 = arith.mulf %157, %140 : vector<8x32xf32>
    %161 = arith.mulf %156, %158 : vector<8x32xf32>
    %162 = arith.addf %160, %161 : vector<8x32xf32>
    %163 = math.tanh %162 : vector<8x32xf32>
    %164 = arith.mulf %159, %163 : vector<8x32xf32>
    %c6_64 = arith.constant 6 : index
    %c0_65 = arith.constant 0 : index
    %c0_66 = arith.constant 0 : index
    %165 = vector.load %arg16[%c6_64, %c0_65, %c0_66] : memref<8x8x32xf32, #tpu.memory_space<vmem>>, vector<1x8x32xf32>
    %166 = vector.shape_cast %165 : vector<1x8x32xf32> to vector<8x32xf32>
    %167 = vector.shape_cast %164 : vector<8x32xf32> to vector<1x8x32xf32>
    tpu.vector_store %arg16[%c6_64, %c0_65, %c0_66], %167 {strides = array<i32>} : memref<8x8x32xf32, #tpu.memory_space<vmem>>, vector<1x8x32xf32>,
    %cst_67 = arith.constant dense<0.000000e+00> : vector<8x128xf32>
    %168 = tpu.matmul %164, %1, %cst_67 {dimension_numbers = #tpu.dot_dimension_numbers<[1], [0], [0], [1], [0, 0, 1, 1], [], []>} : vector<8x32xf32>, vector<32x128xf32>, vector<8x128xf32> -> vector<8x128xf32>
    %c7 = arith.constant 7 : index
    %c0_68 = arith.constant 0 : index
    %c0_69 = arith.constant 0 : index
    %169 = vector.load %arg17[%c7, %c0_68, %c0_69] : memref<8x8x128xf32, #tpu.memory_space<vmem>>, vector<1x8x128xf32>
    %170 = vector.shape_cast %169 : vector<1x8x128xf32> to vector<8x128xf32>
    %171 = arith.addf %168, %170 : vector<8x128xf32>
    %172 = arith.negf %171 : vector<8x128xf32>
    %173 = math.exp %172 : vector<8x128xf32>
    %cst_70 = arith.constant 1.000000e+00 : f32
    %174 = vector.broadcast %cst_70 : f32 to vector<8x128xf32>
    %175 = arith.addf %174, %173 : vector<8x128xf32>
    %176 = arith.divf %174, %175 : vector<8x128xf32>
    %177 = math.tanh %171 : vector<8x128xf32>
    %178 = vector.extract_strided_slice %176 {offsets = [0, 0], sizes = [8, 32], strides = [1, 1]} : vector<8x128xf32> to vector<8x32xf32>
    %179 = vector.extract_strided_slice %176 {offsets = [0, 32], sizes = [8, 32], strides = [1, 1]} : vector<8x128xf32> to vector<8x32xf32>
    %180 = vector.extract_strided_slice %177 {offsets = [0, 64], sizes = [8, 32], strides = [1, 1]} : vector<8x128xf32> to vector<8x32xf32>
    %181 = vector.extract_strided_slice %176 {offsets = [0, 96], sizes = [8, 32], strides = [1, 1]} : vector<8x128xf32> to vector<8x32xf32>
    %182 = arith.mulf %179, %162 : vector<8x32xf32>
    %183 = arith.mulf %178, %180 : vector<8x32xf32>
    %184 = arith.addf %182, %183 : vector<8x32xf32>
    %185 = math.tanh %184 : vector<8x32xf32>
    %186 = arith.mulf %181, %185 : vector<8x32xf32>
    %c7_71 = arith.constant 7 : index
    %c0_72 = arith.constant 0 : index
    %c0_73 = arith.constant 0 : index
    %187 = vector.load %arg16[%c7_71, %c0_72, %c0_73] : memref<8x8x32xf32, #tpu.memory_space<vmem>>, vector<1x8x32xf32>
    %188 = vector.shape_cast %187 : vector<1x8x32xf32> to vector<8x32xf32>
    %189 = vector.shape_cast %186 : vector<8x32xf32> to vector<1x8x32xf32>
    tpu.vector_store %arg16[%c7_71, %c0_72, %c0_73], %189 {strides = array<i32>} : memref<8x8x32xf32, #tpu.memory_space<vmem>>, vector<1x8x32xf32>,
    %c0_74 = arith.constant 0 : index
    %c0_75 = arith.constant 0 : index
    %c0_76 = arith.constant 0 : index
    %190 = vector.load %arg14[%c0_74, %c0_75, %c0_76] : memref<2x8x32xf32, #tpu.memory_space<vmem>>, vector<1x8x32xf32>
    %191 = vector.shape_cast %190 : vector<1x8x32xf32> to vector<8x32xf32>
    %192 = vector.shape_cast %186 : vector<8x32xf32> to vector<1x8x32xf32>
    tpu.vector_store %arg14[%c0_74, %c0_75, %c0_76], %192 {strides = array<i32>} : memref<2x8x32xf32, #tpu.memory_space<vmem>>, vector<1x8x32xf32>,
    %c0_77 = arith.constant 0 : index
    %c0_78 = arith.constant 0 : index
    %c0_79 = arith.constant 0 : index
    %193 = vector.load %arg15[%c0_77, %c0_78, %c0_79] : memref<2x8x32xf32, #tpu.memory_space<vmem>>, vector<1x8x32xf32>
    %194 = vector.shape_cast %193 : vector<1x8x32xf32> to vector<8x32xf32>
    %195 = vector.shape_cast %184 : vector<8x32xf32> to vector<1x8x32xf32>
    tpu.vector_store %arg15[%c0_77, %c0_78, %c0_79], %195 {strides = array<i32>} : memref<2x8x32xf32, #tpu.memory_space<vmem>>, vector<1x8x32xf32>,
    %c0_80 = arith.constant 0 : index
    %c0_81 = arith.constant 0 : index
    %196 = vector.load %arg6[%c0_80, %c0_81] : memref<32x128xf32, #tpu.memory_space<vmem>>, vector<32x128xf32>
    %c0_82 = arith.constant 0 : index
    %c0_83 = arith.constant 0 : index
    %197 = vector.load %arg7[%c0_82, %c0_83] : memref<32x128xf32, #tpu.memory_space<vmem>>, vector<32x128xf32>
    %c0_84 = arith.constant 0 : index
    %c0_85 = arith.constant 0 : index
    %198 = vector.load %arg8[%c0_84, %c0_85] : memref<1x128xf32, #tpu.memory_space<vmem>>, vector<1x128xf32>
    %c0_86 = arith.constant 0 : index
    %c0_87 = arith.constant 0 : index
    %c0_88 = arith.constant 0 : index
    %199 = vector.load %arg16[%c0_86, %c0_87, %c0_88] : memref<8x8x32xf32, #tpu.memory_space<vmem>>, vector<8x8x32xf32>
    %200 = vector.shape_cast %199 : vector<8x8x32xf32> to vector<64x32xf32>
    %cst_89 = arith.constant dense<0.000000e+00> : vector<64x128xf32>
    %201 = tpu.matmul %200, %196, %cst_89 {dimension_numbers = #tpu.dot_dimension_numbers<[1], [0], [0], [1], [0, 0, 1, 1], [], []>} : vector<64x32xf32>, vector<32x128xf32>, vector<64x128xf32> -> vector<64x128xf32>
    %202 = vector.broadcast %198 : vector<1x128xf32> to vector<64x128xf32>
    %203 = arith.addf %201, %202 : vector<64x128xf32>
    %204 = vector.shape_cast %203 : vector<64x128xf32> to vector<8x8x128xf32>
    %c0_90 = arith.constant 0 : index
    %c0_91 = arith.constant 0 : index
    %c0_92 = arith.constant 0 : index
    %205 = vector.load %arg17[%c0_90, %c0_91, %c0_92] : memref<8x8x128xf32, #tpu.memory_space<vmem>>, vector<8x8x128xf32>
    tpu.vector_store %arg17[%c0_90, %c0_91, %c0_92], %204 {strides = array<i32>} : memref<8x8x128xf32, #tpu.memory_space<vmem>>, vector<8x8x128xf32>,
    %c1_93 = arith.constant 1 : index
    %c0_94 = arith.constant 0 : index
    %c0_95 = arith.constant 0 : index
    %206 = vector.load %arg1[%c1_93, %c0_94, %c0_95] : memref<2x8x32xf32, #tpu.memory_space<vmem>>, vector<1x8x32xf32>
    %207 = vector.shape_cast %206 : vector<1x8x32xf32> to vector<8x32xf32>
    %c1_96 = arith.constant 1 : index
    %c0_97 = arith.constant 0 : index
    %c0_98 = arith.constant 0 : index
    %208 = vector.load %arg2[%c1_96, %c0_97, %c0_98] : memref<2x8x32xf32, #tpu.memory_space<vmem>>, vector<1x8x32xf32>
    %209 = vector.shape_cast %208 : vector<1x8x32xf32> to vector<8x32xf32>
    %cst_99 = arith.constant dense<0.000000e+00> : vector<8x128xf32>
    %210 = tpu.matmul %207, %197, %cst_99 {dimension_numbers = #tpu.dot_dimension_numbers<[1], [0], [0], [1], [0, 0, 1, 1], [], []>} : vector<8x32xf32>, vector<32x128xf32>, vector<8x128xf32> -> vector<8x128xf32>
    %c0_100 = arith.constant 0 : index
    %c0_101 = arith.constant 0 : index
    %c0_102 = arith.constant 0 : index
    %211 = vector.load %arg17[%c0_100, %c0_101, %c0_102] : memref<8x8x128xf32, #tpu.memory_space<vmem>>, vector<1x8x128xf32>
    %212 = vector.shape_cast %211 : vector<1x8x128xf32> to vector<8x128xf32>
    %213 = arith.addf %210, %212 : vector<8x128xf32>
    %214 = arith.negf %213 : vector<8x128xf32>
    %215 = math.exp %214 : vector<8x128xf32>
    %cst_103 = arith.constant 1.000000e+00 : f32
    %216 = vector.broadcast %cst_103 : f32 to vector<8x128xf32>
    %217 = arith.addf %216, %215 : vector<8x128xf32>
    %218 = arith.divf %216, %217 : vector<8x128xf32>
    %219 = math.tanh %213 : vector<8x128xf32>
    %220 = vector.extract_strided_slice %218 {offsets = [0, 0], sizes = [8, 32], strides = [1, 1]} : vector<8x128xf32> to vector<8x32xf32>
    %221 = vector.extract_strided_slice %218 {offsets = [0, 32], sizes = [8, 32], strides = [1, 1]} : vector<8x128xf32> to vector<8x32xf32>
    %222 = vector.extract_strided_slice %219 {offsets = [0, 64], sizes = [8, 32], strides = [1, 1]} : vector<8x128xf32> to vector<8x32xf32>
    %223 = vector.extract_strided_slice %218 {offsets = [0, 96], sizes = [8, 32], strides = [1, 1]} : vector<8x128xf32> to vector<8x32xf32>
    %224 = arith.mulf %221, %209 : vector<8x32xf32>
    %225 = arith.mulf %220, %222 : vector<8x32xf32>
    %226 = arith.addf %224, %225 : vector<8x32xf32>
    %227 = math.tanh %226 : vector<8x32xf32>
    %228 = arith.mulf %223, %227 : vector<8x32xf32>
    %c0_104 = arith.constant 0 : index
    %c0_105 = arith.constant 0 : index
    %c0_106 = arith.constant 0 : index
    %229 = vector.load %arg16[%c0_104, %c0_105, %c0_106] : memref<8x8x32xf32, #tpu.memory_space<vmem>>, vector<1x8x32xf32>
    %230 = vector.shape_cast %229 : vector<1x8x32xf32> to vector<8x32xf32>
    %231 = vector.shape_cast %228 : vector<8x32xf32> to vector<1x8x32xf32>
    tpu.vector_store %arg16[%c0_104, %c0_105, %c0_106], %231 {strides = array<i32>} : memref<8x8x32xf32, #tpu.memory_space<vmem>>, vector<1x8x32xf32>,
    %cst_107 = arith.constant dense<0.000000e+00> : vector<8x128xf32>
    %232 = tpu.matmul %228, %197, %cst_107 {dimension_numbers = #tpu.dot_dimension_numbers<[1], [0], [0], [1], [0, 0, 1, 1], [], []>} : vector<8x32xf32>, vector<32x128xf32>, vector<8x128xf32> -> vector<8x128xf32>
    %c1_108 = arith.constant 1 : index
    %c0_109 = arith.constant 0 : index
    %c0_110 = arith.constant 0 : index
    %233 = vector.load %arg17[%c1_108, %c0_109, %c0_110] : memref<8x8x128xf32, #tpu.memory_space<vmem>>, vector<1x8x128xf32>
    %234 = vector.shape_cast %233 : vector<1x8x128xf32> to vector<8x128xf32>
    %235 = arith.addf %232, %234 : vector<8x128xf32>
    %236 = arith.negf %235 : vector<8x128xf32>
    %237 = math.exp %236 : vector<8x128xf32>
    %cst_111 = arith.constant 1.000000e+00 : f32
    %238 = vector.broadcast %cst_111 : f32 to vector<8x128xf32>
    %239 = arith.addf %238, %237 : vector<8x128xf32>
    %240 = arith.divf %238, %239 : vector<8x128xf32>
    %241 = math.tanh %235 : vector<8x128xf32>
    %242 = vector.extract_strided_slice %240 {offsets = [0, 0], sizes = [8, 32], strides = [1, 1]} : vector<8x128xf32> to vector<8x32xf32>
    %243 = vector.extract_strided_slice %240 {offsets = [0, 32], sizes = [8, 32], strides = [1, 1]} : vector<8x128xf32> to vector<8x32xf32>
    %244 = vector.extract_strided_slice %241 {offsets = [0, 64], sizes = [8, 32], strides = [1, 1]} : vector<8x128xf32> to vector<8x32xf32>
    %245 = vector.extract_strided_slice %240 {offsets = [0, 96], sizes = [8, 32], strides = [1, 1]} : vector<8x128xf32> to vector<8x32xf32>
    %246 = arith.mulf %243, %226 : vector<8x32xf32>
    %247 = arith.mulf %242, %244 : vector<8x32xf32>
    %248 = arith.addf %246, %247 : vector<8x32xf32>
    %249 = math.tanh %248 : vector<8x32xf32>
    %250 = arith.mulf %245, %249 : vector<8x32xf32>
    %c1_112 = arith.constant 1 : index
    %c0_113 = arith.constant 0 : index
    %c0_114 = arith.constant 0 : index
    %251 = vector.load %arg16[%c1_112, %c0_113, %c0_114] : memref<8x8x32xf32, #tpu.memory_space<vmem>>, vector<1x8x32xf32>
    %252 = vector.shape_cast %251 : vector<1x8x32xf32> to vector<8x32xf32>
    %253 = vector.shape_cast %250 : vector<8x32xf32> to vector<1x8x32xf32>
    tpu.vector_store %arg16[%c1_112, %c0_113, %c0_114], %253 {strides = array<i32>} : memref<8x8x32xf32, #tpu.memory_space<vmem>>, vector<1x8x32xf32>,
    %cst_115 = arith.constant dense<0.000000e+00> : vector<8x128xf32>
    %254 = tpu.matmul %250, %197, %cst_115 {dimension_numbers = #tpu.dot_dimension_numbers<[1], [0], [0], [1], [0, 0, 1, 1], [], []>} : vector<8x32xf32>, vector<32x128xf32>, vector<8x128xf32> -> vector<8x128xf32>
    %c2_116 = arith.constant 2 : index
    %c0_117 = arith.constant 0 : index
    %c0_118 = arith.constant 0 : index
    %255 = vector.load %arg17[%c2_116, %c0_117, %c0_118] : memref<8x8x128xf32, #tpu.memory_space<vmem>>, vector<1x8x128xf32>
    %256 = vector.shape_cast %255 : vector<1x8x128xf32> to vector<8x128xf32>
    %257 = arith.addf %254, %256 : vector<8x128xf32>
    %258 = arith.negf %257 : vector<8x128xf32>
    %259 = math.exp %258 : vector<8x128xf32>
    %cst_119 = arith.constant 1.000000e+00 : f32
    %260 = vector.broadcast %cst_119 : f32 to vector<8x128xf32>
    %261 = arith.addf %260, %259 : vector<8x128xf32>
    %262 = arith.divf %260, %261 : vector<8x128xf32>
    %263 = math.tanh %257 : vector<8x128xf32>
    %264 = vector.extract_strided_slice %262 {offsets = [0, 0], sizes = [8, 32], strides = [1, 1]} : vector<8x128xf32> to vector<8x32xf32>
    %265 = vector.extract_strided_slice %262 {offsets = [0, 32], sizes = [8, 32], strides = [1, 1]} : vector<8x128xf32> to vector<8x32xf32>
    %266 = vector.extract_strided_slice %263 {offsets = [0, 64], sizes = [8, 32], strides = [1, 1]} : vector<8x128xf32> to vector<8x32xf32>
    %267 = vector.extract_strided_slice %262 {offsets = [0, 96], sizes = [8, 32], strides = [1, 1]} : vector<8x128xf32> to vector<8x32xf32>
    %268 = arith.mulf %265, %248 : vector<8x32xf32>
    %269 = arith.mulf %264, %266 : vector<8x32xf32>
    %270 = arith.addf %268, %269 : vector<8x32xf32>
    %271 = math.tanh %270 : vector<8x32xf32>
    %272 = arith.mulf %267, %271 : vector<8x32xf32>
    %c2_120 = arith.constant 2 : index
    %c0_121 = arith.constant 0 : index
    %c0_122 = arith.constant 0 : index
    %273 = vector.load %arg16[%c2_120, %c0_121, %c0_122] : memref<8x8x32xf32, #tpu.memory_space<vmem>>, vector<1x8x32xf32>
    %274 = vector.shape_cast %273 : vector<1x8x32xf32> to vector<8x32xf32>
    %275 = vector.shape_cast %272 : vector<8x32xf32> to vector<1x8x32xf32>
    tpu.vector_store %arg16[%c2_120, %c0_121, %c0_122], %275 {strides = array<i32>} : memref<8x8x32xf32, #tpu.memory_space<vmem>>, vector<1x8x32xf32>,
    %cst_123 = arith.constant dense<0.000000e+00> : vector<8x128xf32>
    %276 = tpu.matmul %272, %197, %cst_123 {dimension_numbers = #tpu.dot_dimension_numbers<[1], [0], [0], [1], [0, 0, 1, 1], [], []>} : vector<8x32xf32>, vector<32x128xf32>, vector<8x128xf32> -> vector<8x128xf32>
    %c3_124 = arith.constant 3 : index
    %c0_125 = arith.constant 0 : index
    %c0_126 = arith.constant 0 : index
    %277 = vector.load %arg17[%c3_124, %c0_125, %c0_126] : memref<8x8x128xf32, #tpu.memory_space<vmem>>, vector<1x8x128xf32>
    %278 = vector.shape_cast %277 : vector<1x8x128xf32> to vector<8x128xf32>
    %279 = arith.addf %276, %278 : vector<8x128xf32>
    %280 = arith.negf %279 : vector<8x128xf32>
    %281 = math.exp %280 : vector<8x128xf32>
    %cst_127 = arith.constant 1.000000e+00 : f32
    %282 = vector.broadcast %cst_127 : f32 to vector<8x128xf32>
    %283 = arith.addf %282, %281 : vector<8x128xf32>
    %284 = arith.divf %282, %283 : vector<8x128xf32>
    %285 = math.tanh %279 : vector<8x128xf32>
    %286 = vector.extract_strided_slice %284 {offsets = [0, 0], sizes = [8, 32], strides = [1, 1]} : vector<8x128xf32> to vector<8x32xf32>
    %287 = vector.extract_strided_slice %284 {offsets = [0, 32], sizes = [8, 32], strides = [1, 1]} : vector<8x128xf32> to vector<8x32xf32>
    %288 = vector.extract_strided_slice %285 {offsets = [0, 64], sizes = [8, 32], strides = [1, 1]} : vector<8x128xf32> to vector<8x32xf32>
    %289 = vector.extract_strided_slice %284 {offsets = [0, 96], sizes = [8, 32], strides = [1, 1]} : vector<8x128xf32> to vector<8x32xf32>
    %290 = arith.mulf %287, %270 : vector<8x32xf32>
    %291 = arith.mulf %286, %288 : vector<8x32xf32>
    %292 = arith.addf %290, %291 : vector<8x32xf32>
    %293 = math.tanh %292 : vector<8x32xf32>
    %294 = arith.mulf %289, %293 : vector<8x32xf32>
    %c3_128 = arith.constant 3 : index
    %c0_129 = arith.constant 0 : index
    %c0_130 = arith.constant 0 : index
    %295 = vector.load %arg16[%c3_128, %c0_129, %c0_130] : memref<8x8x32xf32, #tpu.memory_space<vmem>>, vector<1x8x32xf32>
    %296 = vector.shape_cast %295 : vector<1x8x32xf32> to vector<8x32xf32>
    %297 = vector.shape_cast %294 : vector<8x32xf32> to vector<1x8x32xf32>
    tpu.vector_store %arg16[%c3_128, %c0_129, %c0_130], %297 {strides = array<i32>} : memref<8x8x32xf32, #tpu.memory_space<vmem>>, vector<1x8x32xf32>,
    %cst_131 = arith.constant dense<0.000000e+00> : vector<8x128xf32>
    %298 = tpu.matmul %294, %197, %cst_131 {dimension_numbers = #tpu.dot_dimension_numbers<[1], [0], [0], [1], [0, 0, 1, 1], [], []>} : vector<8x32xf32>, vector<32x128xf32>, vector<8x128xf32> -> vector<8x128xf32>
    %c4_132 = arith.constant 4 : index
    %c0_133 = arith.constant 0 : index
    %c0_134 = arith.constant 0 : index
    %299 = vector.load %arg17[%c4_132, %c0_133, %c0_134] : memref<8x8x128xf32, #tpu.memory_space<vmem>>, vector<1x8x128xf32>
    %300 = vector.shape_cast %299 : vector<1x8x128xf32> to vector<8x128xf32>
    %301 = arith.addf %298, %300 : vector<8x128xf32>
    %302 = arith.negf %301 : vector<8x128xf32>
    %303 = math.exp %302 : vector<8x128xf32>
    %cst_135 = arith.constant 1.000000e+00 : f32
    %304 = vector.broadcast %cst_135 : f32 to vector<8x128xf32>
    %305 = arith.addf %304, %303 : vector<8x128xf32>
    %306 = arith.divf %304, %305 : vector<8x128xf32>
    %307 = math.tanh %301 : vector<8x128xf32>
    %308 = vector.extract_strided_slice %306 {offsets = [0, 0], sizes = [8, 32], strides = [1, 1]} : vector<8x128xf32> to vector<8x32xf32>
    %309 = vector.extract_strided_slice %306 {offsets = [0, 32], sizes = [8, 32], strides = [1, 1]} : vector<8x128xf32> to vector<8x32xf32>
    %310 = vector.extract_strided_slice %307 {offsets = [0, 64], sizes = [8, 32], strides = [1, 1]} : vector<8x128xf32> to vector<8x32xf32>
    %311 = vector.extract_strided_slice %306 {offsets = [0, 96], sizes = [8, 32], strides = [1, 1]} : vector<8x128xf32> to vector<8x32xf32>
    %312 = arith.mulf %309, %292 : vector<8x32xf32>
    %313 = arith.mulf %308, %310 : vector<8x32xf32>
    %314 = arith.addf %312, %313 : vector<8x32xf32>
    %315 = math.tanh %314 : vector<8x32xf32>
    %316 = arith.mulf %311, %315 : vector<8x32xf32>
    %c4_136 = arith.constant 4 : index
    %c0_137 = arith.constant 0 : index
    %c0_138 = arith.constant 0 : index
    %317 = vector.load %arg16[%c4_136, %c0_137, %c0_138] : memref<8x8x32xf32, #tpu.memory_space<vmem>>, vector<1x8x32xf32>
    %318 = vector.shape_cast %317 : vector<1x8x32xf32> to vector<8x32xf32>
    %319 = vector.shape_cast %316 : vector<8x32xf32> to vector<1x8x32xf32>
    tpu.vector_store %arg16[%c4_136, %c0_137, %c0_138], %319 {strides = array<i32>} : memref<8x8x32xf32, #tpu.memory_space<vmem>>, vector<1x8x32xf32>,
    %cst_139 = arith.constant dense<0.000000e+00> : vector<8x128xf32>
    %320 = tpu.matmul %316, %197, %cst_139 {dimension_numbers = #tpu.dot_dimension_numbers<[1], [0], [0], [1], [0, 0, 1, 1], [], []>} : vector<8x32xf32>, vector<32x128xf32>, vector<8x128xf32> -> vector<8x128xf32>
    %c5_140 = arith.constant 5 : index
    %c0_141 = arith.constant 0 : index
    %c0_142 = arith.constant 0 : index
    %321 = vector.load %arg17[%c5_140, %c0_141, %c0_142] : memref<8x8x128xf32, #tpu.memory_space<vmem>>, vector<1x8x128xf32>
    %322 = vector.shape_cast %321 : vector<1x8x128xf32> to vector<8x128xf32>
    %323 = arith.addf %320, %322 : vector<8x128xf32>
    %324 = arith.negf %323 : vector<8x128xf32>
    %325 = math.exp %324 : vector<8x128xf32>
    %cst_143 = arith.constant 1.000000e+00 : f32
    %326 = vector.broadcast %cst_143 : f32 to vector<8x128xf32>
    %327 = arith.addf %326, %325 : vector<8x128xf32>
    %328 = arith.divf %326, %327 : vector<8x128xf32>
    %329 = math.tanh %323 : vector<8x128xf32>
    %330 = vector.extract_strided_slice %328 {offsets = [0, 0], sizes = [8, 32], strides = [1, 1]} : vector<8x128xf32> to vector<8x32xf32>
    %331 = vector.extract_strided_slice %328 {offsets = [0, 32], sizes = [8, 32], strides = [1, 1]} : vector<8x128xf32> to vector<8x32xf32>
    %332 = vector.extract_strided_slice %329 {offsets = [0, 64], sizes = [8, 32], strides = [1, 1]} : vector<8x128xf32> to vector<8x32xf32>
    %333 = vector.extract_strided_slice %328 {offsets = [0, 96], sizes = [8, 32], strides = [1, 1]} : vector<8x128xf32> to vector<8x32xf32>
    %334 = arith.mulf %331, %314 : vector<8x32xf32>
    %335 = arith.mulf %330, %332 : vector<8x32xf32>
    %336 = arith.addf %334, %335 : vector<8x32xf32>
    %337 = math.tanh %336 : vector<8x32xf32>
    %338 = arith.mulf %333, %337 : vector<8x32xf32>
    %c5_144 = arith.constant 5 : index
    %c0_145 = arith.constant 0 : index
    %c0_146 = arith.constant 0 : index
    %339 = vector.load %arg16[%c5_144, %c0_145, %c0_146] : memref<8x8x32xf32, #tpu.memory_space<vmem>>, vector<1x8x32xf32>
    %340 = vector.shape_cast %339 : vector<1x8x32xf32> to vector<8x32xf32>
    %341 = vector.shape_cast %338 : vector<8x32xf32> to vector<1x8x32xf32>
    tpu.vector_store %arg16[%c5_144, %c0_145, %c0_146], %341 {strides = array<i32>} : memref<8x8x32xf32, #tpu.memory_space<vmem>>, vector<1x8x32xf32>,
    %cst_147 = arith.constant dense<0.000000e+00> : vector<8x128xf32>
    %342 = tpu.matmul %338, %197, %cst_147 {dimension_numbers = #tpu.dot_dimension_numbers<[1], [0], [0], [1], [0, 0, 1, 1], [], []>} : vector<8x32xf32>, vector<32x128xf32>, vector<8x128xf32> -> vector<8x128xf32>
    %c6_148 = arith.constant 6 : index
    %c0_149 = arith.constant 0 : index
    %c0_150 = arith.constant 0 : index
    %343 = vector.load %arg17[%c6_148, %c0_149, %c0_150] : memref<8x8x128xf32, #tpu.memory_space<vmem>>, vector<1x8x128xf32>
    %344 = vector.shape_cast %343 : vector<1x8x128xf32> to vector<8x128xf32>
    %345 = arith.addf %342, %344 : vector<8x128xf32>
    %346 = arith.negf %345 : vector<8x128xf32>
    %347 = math.exp %346 : vector<8x128xf32>
    %cst_151 = arith.constant 1.000000e+00 : f32
    %348 = vector.broadcast %cst_151 : f32 to vector<8x128xf32>
    %349 = arith.addf %348, %347 : vector<8x128xf32>
    %350 = arith.divf %348, %349 : vector<8x128xf32>
    %351 = math.tanh %345 : vector<8x128xf32>
    %352 = vector.extract_strided_slice %350 {offsets = [0, 0], sizes = [8, 32], strides = [1, 1]} : vector<8x128xf32> to vector<8x32xf32>
    %353 = vector.extract_strided_slice %350 {offsets = [0, 32], sizes = [8, 32], strides = [1, 1]} : vector<8x128xf32> to vector<8x32xf32>
    %354 = vector.extract_strided_slice %351 {offsets = [0, 64], sizes = [8, 32], strides = [1, 1]} : vector<8x128xf32> to vector<8x32xf32>
    %355 = vector.extract_strided_slice %350 {offsets = [0, 96], sizes = [8, 32], strides = [1, 1]} : vector<8x128xf32> to vector<8x32xf32>
    %356 = arith.mulf %353, %336 : vector<8x32xf32>
    %357 = arith.mulf %352, %354 : vector<8x32xf32>
    %358 = arith.addf %356, %357 : vector<8x32xf32>
    %359 = math.tanh %358 : vector<8x32xf32>
    %360 = arith.mulf %355, %359 : vector<8x32xf32>
    %c6_152 = arith.constant 6 : index
    %c0_153 = arith.constant 0 : index
    %c0_154 = arith.constant 0 : index
    %361 = vector.load %arg16[%c6_152, %c0_153, %c0_154] : memref<8x8x32xf32, #tpu.memory_space<vmem>>, vector<1x8x32xf32>
    %362 = vector.shape_cast %361 : vector<1x8x32xf32> to vector<8x32xf32>
    %363 = vector.shape_cast %360 : vector<8x32xf32> to vector<1x8x32xf32>
    tpu.vector_store %arg16[%c6_152, %c0_153, %c0_154], %363 {strides = array<i32>} : memref<8x8x32xf32, #tpu.memory_space<vmem>>, vector<1x8x32xf32>,
    %cst_155 = arith.constant dense<0.000000e+00> : vector<8x128xf32>
    %364 = tpu.matmul %360, %197, %cst_155 {dimension_numbers = #tpu.dot_dimension_numbers<[1], [0], [0], [1], [0, 0, 1, 1], [], []>} : vector<8x32xf32>, vector<32x128xf32>, vector<8x128xf32> -> vector<8x128xf32>
    %c7_156 = arith.constant 7 : index
    %c0_157 = arith.constant 0 : index
    %c0_158 = arith.constant 0 : index
    %365 = vector.load %arg17[%c7_156, %c0_157, %c0_158] : memref<8x8x128xf32, #tpu.memory_space<vmem>>, vector<1x8x128xf32>
    %366 = vector.shape_cast %365 : vector<1x8x128xf32> to vector<8x128xf32>
    %367 = arith.addf %364, %366 : vector<8x128xf32>
    %368 = arith.negf %367 : vector<8x128xf32>
    %369 = math.exp %368 : vector<8x128xf32>
    %cst_159 = arith.constant 1.000000e+00 : f32
    %370 = vector.broadcast %cst_159 : f32 to vector<8x128xf32>
    %371 = arith.addf %370, %369 : vector<8x128xf32>
    %372 = arith.divf %370, %371 : vector<8x128xf32>
    %373 = math.tanh %367 : vector<8x128xf32>
    %374 = vector.extract_strided_slice %372 {offsets = [0, 0], sizes = [8, 32], strides = [1, 1]} : vector<8x128xf32> to vector<8x32xf32>
    %375 = vector.extract_strided_slice %372 {offsets = [0, 32], sizes = [8, 32], strides = [1, 1]} : vector<8x128xf32> to vector<8x32xf32>
    %376 = vector.extract_strided_slice %373 {offsets = [0, 64], sizes = [8, 32], strides = [1, 1]} : vector<8x128xf32> to vector<8x32xf32>
    %377 = vector.extract_strided_slice %372 {offsets = [0, 96], sizes = [8, 32], strides = [1, 1]} : vector<8x128xf32> to vector<8x32xf32>
    %378 = arith.mulf %375, %358 : vector<8x32xf32>
    %379 = arith.mulf %374, %376 : vector<8x32xf32>
    %380 = arith.addf %378, %379 : vector<8x32xf32>
    %381 = math.tanh %380 : vector<8x32xf32>
    %382 = arith.mulf %377, %381 : vector<8x32xf32>
    %c7_160 = arith.constant 7 : index
    %c0_161 = arith.constant 0 : index
    %c0_162 = arith.constant 0 : index
    %383 = vector.load %arg16[%c7_160, %c0_161, %c0_162] : memref<8x8x32xf32, #tpu.memory_space<vmem>>, vector<1x8x32xf32>
    %384 = vector.shape_cast %383 : vector<1x8x32xf32> to vector<8x32xf32>
    %385 = vector.shape_cast %382 : vector<8x32xf32> to vector<1x8x32xf32>
    tpu.vector_store %arg16[%c7_160, %c0_161, %c0_162], %385 {strides = array<i32>} : memref<8x8x32xf32, #tpu.memory_space<vmem>>, vector<1x8x32xf32>,
    %c1_163 = arith.constant 1 : index
    %c0_164 = arith.constant 0 : index
    %c0_165 = arith.constant 0 : index
    %386 = vector.load %arg14[%c1_163, %c0_164, %c0_165] : memref<2x8x32xf32, #tpu.memory_space<vmem>>, vector<1x8x32xf32>
    %387 = vector.shape_cast %386 : vector<1x8x32xf32> to vector<8x32xf32>
    %388 = vector.shape_cast %382 : vector<8x32xf32> to vector<1x8x32xf32>
    tpu.vector_store %arg14[%c1_163, %c0_164, %c0_165], %388 {strides = array<i32>} : memref<2x8x32xf32, #tpu.memory_space<vmem>>, vector<1x8x32xf32>,
    %c1_166 = arith.constant 1 : index
    %c0_167 = arith.constant 0 : index
    %c0_168 = arith.constant 0 : index
    %389 = vector.load %arg15[%c1_166, %c0_167, %c0_168] : memref<2x8x32xf32, #tpu.memory_space<vmem>>, vector<1x8x32xf32>
    %390 = vector.shape_cast %389 : vector<1x8x32xf32> to vector<8x32xf32>
    %391 = vector.shape_cast %380 : vector<8x32xf32> to vector<1x8x32xf32>
    tpu.vector_store %arg15[%c1_166, %c0_167, %c0_168], %391 {strides = array<i32>} : memref<2x8x32xf32, #tpu.memory_space<vmem>>, vector<1x8x32xf32>,
    %c0_169 = arith.constant 0 : index
    %c0_170 = arith.constant 0 : index
    %c0_171 = arith.constant 0 : index
    %392 = vector.load %arg16[%c0_169, %c0_170, %c0_171] : memref<8x8x32xf32, #tpu.memory_space<vmem>>, vector<8x8x32xf32>
    %393 = vector.shape_cast %392 : vector<8x8x32xf32> to vector<64x32xf32>
    %c0_172 = arith.constant 0 : index
    %c0_173 = arith.constant 0 : index
    %394 = vector.load %arg9[%c0_172, %c0_173] : memref<32x128xf32, #tpu.memory_space<vmem>>, vector<32x128xf32>
    %cst_174 = arith.constant dense<0.000000e+00> : vector<64x128xf32>
    %395 = tpu.matmul %393, %394, %cst_174 {dimension_numbers = #tpu.dot_dimension_numbers<[1], [0], [0], [1], [0, 0, 1, 1], [], []>} : vector<64x32xf32>, vector<32x128xf32>, vector<64x128xf32> -> vector<64x128xf32>
    %c0_175 = arith.constant 0 : index
    %c0_176 = arith.constant 0 : index
    %396 = vector.load %arg10[%c0_175, %c0_176] : memref<1x128xf32, #tpu.memory_space<vmem>>, vector<1x128xf32>
    %397 = vector.broadcast %396 : vector<1x128xf32> to vector<64x128xf32>
    %398 = arith.addf %395, %397 : vector<64x128xf32>
    %cst_177 = arith.constant 0.000000e+00 : f32
    %399 = vector.broadcast %cst_177 : f32 to vector<64x128xf32>
    %400 = arith.cmpf oge, %398, %399 : vector<64x128xf32>
    %cst_178 = arith.constant 0.00999999977 : f32
    %401 = vector.broadcast %cst_178 : f32 to vector<64x128xf32>
    %402 = arith.mulf %401, %398 : vector<64x128xf32>
    %403 = arith.select %400, %398, %402 : vector<64x128xi1>, vector<64x128xf32>
    %c0_179 = arith.constant 0 : index
    %c0_180 = arith.constant 0 : index
    %404 = vector.load %arg11[%c0_179, %c0_180] : memref<128x128xf32, #tpu.memory_space<vmem>>, vector<128x128xf32>
    %cst_181 = arith.constant dense<0.000000e+00> : vector<64x128xf32>
    %405 = tpu.matmul %403, %404, %cst_181 {dimension_numbers = #tpu.dot_dimension_numbers<[1], [0], [0], [1], [0, 0, 1, 1], [], []>} : vector<64x128xf32>, vector<128x128xf32>, vector<64x128xf32> -> vector<64x128xf32>
    %c0_182 = arith.constant 0 : index
    %c0_183 = arith.constant 0 : index
    %406 = vector.load %arg12[%c0_182, %c0_183] : memref<1x128xf32, #tpu.memory_space<vmem>>, vector<1x128xf32>
    %407 = vector.broadcast %406 : vector<1x128xf32> to vector<64x128xf32>
    %408 = arith.addf %405, %407 : vector<64x128xf32>
    %c0_184 = arith.constant 0 : index
    %c0_185 = arith.constant 0 : index
    %409 = vector.load %arg13[%c0_184, %c0_185] : memref<64x128xf32, #tpu.memory_space<vmem>>, vector<64x128xf32>
    tpu.vector_store %arg13[%c0_184, %c0_185], %408 {strides = array<i32>} : memref<64x128xf32, #tpu.memory_space<vmem>>, vector<64x128xf32>,
    return
  }
}

</mosaic_0001>

<bundles_post_ra>
// kernel: tpu_custom_call.1
= control target key start
LH: loop header
LB: loop body
LE: loop exit
PB: predicated region body
PF: predicated region fallthrough
CT: control target
= control target key end

     0   :  { %21 = vsyncpa [#allocation5], 0  ;;  %s4126_s0 = inlined_call_operand.vmem [shape: f32[8,8,4], index: 0, kind: input, shape index: {}]   ;;  %s4127_s1 = inlined_call_operand.hbm [shape: f32[2,8,32], index: 1, kind: input, shape index: {}]   ;;  %s4128_s2 = inlined_call_operand.hbm [shape: f32[2,8,32], index: 2, kind: input, shape index: {}]   ;;  %s4129_s3 = inlined_call_operand.vmem [shape: f32[4,128], index: 3, kind: input, shape index: {}]   ;;  %s4130_s4 = inlined_call_operand.hbm [shape: f32[32,128], index: 4, kind: input, shape index: {}]   ;;  %s4131_s5 = inlined_call_operand.vmem [shape: f32[1,128], index: 5, kind: input, shape index: {}]   ;;  %s4132_s6 = inlined_call_operand.hbm [shape: f32[32,128], index: 6, kind: input, shape index: {}]   ;;  %s4133_s7 = inlined_call_operand.hbm [shape: f32[32,128], index: 7, kind: input, shape index: {}]   ;;  %s4134_s8 = inlined_call_operand.vmem [shape: f32[1,128], index: 8, kind: input, shape index: {}]   ;;  %s4135_s9 = inlined_call_operand.hbm [shape: f32[32,128], index: 9, kind: input, shape index: {}]   ;;  %s4136_s10 = inlined_call_operand.vmem [shape: f32[1,128], index: 10, kind: input, shape index: {}]   ;;  %s4137_s11 = inlined_call_operand.vmem [shape: f32[128,128], index: 11, kind: input, shape index: {}]   ;;  %s4138_s12 = inlined_call_operand.vmem [shape: f32[1,128], index: 12, kind: input, shape index: {}]   ;;  %s4139_s13 = inlined_call_operand.hbm [shape: f32[64,128], index: 13, kind: output, shape index: {0}]   ;;  %s4140_s14 = inlined_call_operand.hbm [shape: f32[2,8,32], index: 14, kind: output, shape index: {1}]   ;;  %s4141_s15 = inlined_call_operand.hbm [shape: f32[2,8,32], index: 15, kind: output, shape index: {2}]  }
   0x1   :  { %22 = vsyncpa [#allocation8], 0 }
   0x2   :  { %23 = vsyncpa [#allocation11], 0 }
   0x3   :  { %24 = vsyncpa [#allocation14], 0 }
   0x4   :  { %25 = vsyncpa [#allocation6], 0 }
   0x5   :  { %26 = vsyncpa [#allocation17], 0  ;;  %s3460_s18 = smov [#allocation7]   ;;  %s3461_s20 = smov [#allocation10]  }
   0x6   :  { %s46_s19 = sshll.u32 %s3460_s18, 4  ;;  %s74_s21 = sshll.u32 %s3461_s20, 4  ;;  %s47_s19 = int_to_ptr.vmem [resolvable:$true] %s46_s19  ;;  %s3557_s21 = int_to_ptr.vmem [resolvable:$true] %s74_s21 }
   0x7   :  { %s3250_s24 = scalar_lea.hbm %s4128_s2, 256 }
   0x8   :  { %p3251_p0 = scmp.ne.s32.totalorder %s4128_s2, %s3250_s24  ;;  %p3254_p1 = scmp.lt.u32.totalorder %s3250_s24, %s4128_s2 }
   0xa   :  { %p3256_p2 = pnand %p3254_p1, %p3251_p0 }
   0xc   :  { %3259 = shalt.err (!%p3256_p2)
}
   0xd   :  { %s3260_s29 = scalar_lea.vmem %s47_s19, 256  ;;  %p3265_p4 = scmp.lt.s32.totalorder %s47_s19, %s47_s19 }
   0xe   :  { %p3261_p3 = scmp.ne.s32.totalorder %s47_s19, %s3260_s29  ;;  %p3266_p5 = scmp.lt.s32.totalorder %s3260_s29, %s3260_s29 }
  0x10   :  { %p3267_p6 = por %p3266_p5, %p3265_p4 }
  0x12   :  { %p3268_p7 = pnand %p3267_p6, %p3261_p3 }
  0x14   :  { %3271 = shalt.err (!%p3268_p7)
}
  0x15   :  { %s3462_s30 = smov 128   ;;  %s3463_s16 = smov 8  }
  0x16   :  { %52 = dma.hbm_to_vmem [thread:$0]  %s4128_s2, 256, %s47_s19, [#allocation8], %s3462_s30, %s3462_s30, %s3463_s16  }
  0x17   :  { %s3272_s23 = scalar_lea.hbm %s4132_s6, 512 }
  0x18   :  { %p3273_p8 = scmp.ne.s32.totalorder %s4132_s6, %s3272_s23  ;;  %p3276_p9 = scmp.lt.u32.totalorder %s3272_s23, %s4132_s6 }
  0x1a   :  { %p3278_p10 = pnand %p3276_p9, %p3273_p8 }
  0x1c   :  { %3281 = shalt.err (!%p3278_p10)
}
  0x1d   :  { %s3282_s28 = scalar_lea.vmem %s3557_s21, 512  ;;  %p3287_p12 = scmp.lt.s32.totalorder %s3557_s21, %s3557_s21 }
  0x1e   :  { %p3283_p11 = scmp.ne.s32.totalorder %s3557_s21, %s3282_s28  ;;  %p3288_p13 = scmp.lt.s32.totalorder %s3282_s28, %s3282_s28 }
  0x20   :  { %p3289_p0 = por %p3288_p13, %p3287_p12 }
  0x22   :  { %p3290_p1 = pnand %p3289_p0, %p3283_p11 }
  0x24   :  { %3293 = shalt.err (!%p3290_p1)
}
  0x25   :  { %80 = dma.hbm_to_vmem [thread:$0]  %s4132_s6, 512, %s3557_s21, [#allocation11], %s3462_s30, %s3462_s30, %s3463_s16  }
  0x26   :  { %s3464_s29 = smov [#allocation4]   ;;  %s3465_s18 = smov [#allocation9]  }
  0x27   :  { %s34_s17 = sshll.u32 %s3464_s29, 4  ;;  %s60_s20 = sshll.u32 %s3465_s18, 4  ;;  %s35_s17 = int_to_ptr.vmem [resolvable:$true] %s34_s17  ;;  %s3594_s20 = int_to_ptr.vmem [resolvable:$true] %s60_s20 }
  0x28   :  { %s3294_s24 = scalar_lea.hbm %s4127_s1, 256 }
  0x29   :  { %p3295_p2 = scmp.ne.s32.totalorder %s4127_s1, %s3294_s24  ;;  %p3298_p3 = scmp.lt.u32.totalorder %s3294_s24, %s4127_s1 }
  0x2b   :  { %p3300_p4 = pnand %p3298_p3, %p3295_p2 }
  0x2d   :  { %3303 = shalt.err (!%p3300_p4)
}
  0x2e   :  { %s3304_s6 = scalar_lea.vmem %s35_s17, 256  ;;  %p3309_p6 = scmp.lt.s32.totalorder %s35_s17, %s35_s17 }
  0x2f   :  { %p3305_p5 = scmp.ne.s32.totalorder %s35_s17, %s3304_s6  ;;  %p3310_p7 = scmp.lt.s32.totalorder %s3304_s6, %s3304_s6 }
  0x31   :  { %p3311_p8 = por %p3310_p7, %p3309_p6 }
  0x33   :  { %p3312_p9 = pnand %p3311_p8, %p3305_p5 }
  0x35   :  { %3315 = shalt.err (!%p3312_p9)
}
  0x36   :  { %40 = dma.hbm_to_vmem [thread:$0]  %s4127_s1, 256, %s35_s17, [#allocation5], %s3462_s30, %s3462_s30, %s3463_s16  }
  0x37   :  { %s3316_s18 = scalar_lea.hbm %s4130_s4, 512 }
  0x38   :  { %p3317_p10 = scmp.ne.s32.totalorder %s4130_s4, %s3316_s18  ;;  %p3320_p11 = scmp.lt.u32.totalorder %s3316_s18, %s4130_s4 }
  0x3a   :  { %p3322_p12 = pnand %p3320_p11, %p3317_p10 }
  0x3c   :  { %3325 = shalt.err (!%p3322_p12)
}
  0x3d   :  { %s3326_s26 = scalar_lea.vmem %s3594_s20, 512  ;;  %p3331_p0 = scmp.lt.s32.totalorder %s3594_s20, %s3594_s20 }
  0x3e   :  { %p3327_p13 = scmp.ne.s32.totalorder %s3594_s20, %s3326_s26  ;;  %p3332_p1 = scmp.lt.s32.totalorder %s3326_s26, %s3326_s26 }
  0x40   :  { %p3333_p2 = por %p3332_p1, %p3331_p0 }
  0x42   :  { %p3334_p3 = pnand %p3333_p2, %p3327_p13 }
  0x44   :  { %3337 = shalt.err (!%p3334_p3)
}
  0x45   :  { %66 = dma.hbm_to_vmem [thread:$0]  %s4130_s4, 512, %s3594_s20, [#allocation8], %s3462_s30, %s3462_s30, %s3463_s16  }
  0x46   :  { %s3466_s27 = smov [#allocation12]   ;;  %s3467_s6 = smov [#allocation13]  }
  0x47   :  { %s86_s28 = sshll.u32 %s3466_s27, 4  ;;  %s100_s21 = sshll.u32 %s3467_s6, 4  ;;  %s87_s28 = int_to_ptr.vmem [resolvable:$true] %s86_s28  ;;  %s3631_s21 = int_to_ptr.vmem [resolvable:$true] %s100_s21 }
  0x48   :  { %s3338_s29 = scalar_lea.hbm %s4133_s7, 512 }
  0x49   :  { %p3339_p4 = scmp.ne.s32.totalorder %s4133_s7, %s3338_s29  ;;  %p3342_p5 = scmp.lt.u32.totalorder %s3338_s29, %s4133_s7 }
  0x4b   :  { %p3344_p6 = pnand %p3342_p5, %p3339_p4 }
  0x4d   :  { %3347 = shalt.err (!%p3344_p6)
}
  0x4e   :  { %s3348_s4 = scalar_lea.vmem %s87_s28, 512  ;;  %p3353_p8 = scmp.lt.s32.totalorder %s87_s28, %s87_s28 }
  0x4f   :  { %p3349_p7 = scmp.ne.s32.totalorder %s87_s28, %s3348_s4  ;;  %p3354_p9 = scmp.lt.s32.totalorder %s3348_s4, %s3348_s4 }
  0x51   :  { %p3355_p10 = por %p3354_p9, %p3353_p8 }
  0x53   :  { %p3356_p11 = pnand %p3355_p10, %p3349_p7 }
  0x55   :  { %3359 = shalt.err (!%p3356_p11)
}
  0x56   :  { %92 = dma.hbm_to_vmem [thread:$0]  %s4133_s7, 512, %s87_s28, [#allocation11], %s3462_s30, %s3462_s30, %s3463_s16  }
  0x57   :  { %s3360_s17 = scalar_lea.hbm %s4135_s9, 512 }
  0x58   :  { %p3361_p12 = scmp.ne.s32.totalorder %s4135_s9, %s3360_s17  ;;  %p3364_p13 = scmp.lt.u32.totalorder %s3360_s17, %s4135_s9 }
  0x5a   :  { %p3366_p0 = pnand %p3364_p13, %p3361_p12 }
  0x5c   :  { %3369 = shalt.err (!%p3366_p0)
}
  0x5d   :  { %s3370_s29 = scalar_lea.vmem %s3631_s21, 512  ;;  %p3375_p2 = scmp.lt.s32.totalorder %s3631_s21, %s3631_s21 }
  0x5e   :  { %p3371_p1 = scmp.ne.s32.totalorder %s3631_s21, %s3370_s29  ;;  %p3376_p3 = scmp.lt.s32.totalorder %s3370_s29, %s3370_s29 }
  0x60   :  { %p3377_p4 = por %p3376_p3, %p3375_p2 }
  0x62   :  { %p3378_p5 = pnand %p3377_p4, %p3371_p1 }
  0x64   :  { %3381 = shalt.err (!%p3378_p5)
}
  0x65   :  { %106 = dma.hbm_to_vmem [thread:$0]  %s4135_s9, 512, %s3631_s21, [#allocation14], %s3462_s30, %s3462_s30, %s3463_s16  }
  0x66   :  { %3448 = dma.done.wait [#allocation5], 256  }
  0x67   :  { %3449 = vsyncadd [#allocation5], 4294967040 }
  0x68   :  { %3450 = dma.done.wait [#allocation8], 768  }
  0x69   :  { %3451 = vsyncadd [#allocation8], 4294966528 }
  0x6a   :  { %3452 = dma.done.wait [#allocation11], 1024  }
  0x6b   :  { %3453 = vsyncadd [#allocation11], 4294966272 }
  0x6c   :  { %3454 = dma.done.wait [#allocation14], 512  }
  0x6d   :  { %3455 = vsyncadd [#allocation14], 4294966784  ;;  %v3468_v0 = vmov 0.0|0.0   ;;  %vm3469_vm0 = vmmov 0   ;;  %v3470_v1 = vmov 0.0   ;;  %vm176_vm1 = vcmask 1043456  }
  0x6e   :  { %2979 = vmatprep.subr.bf16.mxu1 %v3468_v0  ;;  %2742 = vmatprep.mubr.msk.f32.mxu1 %vm3469_vm0, %v3470_v1  ;;  %vm151_vm2 = vcmask 31744   ;;  %v131_v2 = vld [vmem:[%s4129_s3] sm:$0xf]  ;;  %v138_v4 = vld [vmem:[%s4126_s0 + $0x8] sm:$0xff]  ;;  %v139_v7 = vld [vmem:[%s4126_s0 + $0x10] sm:$0xff]  ;;  %vm296_vm3 = vcmask 261120  }
  0x6f   :  { %v137_v3 = vld [vmem:[%s4126_s0] sm:$0xff]  ;;  %2687 = vmatprep.subr.msk.mxu0 %vm176_vm1, %v131_v2  ;;  %v133_v6 = vld [vmem:[#allocation9 + $0x8] sm:$0xff]  ;;  %v134_v9 = vld [vmem:[#allocation9 + $0x10] sm:$0xff]  ;;  %s3472_s28 = smov 32  }
  0x70   :  { %2689 = vmatprep.mubr.msk.f32.mxu0 %vm151_vm2, %v137_v3  ;;  %v132_v5 = vld [vmem:[#allocation9] sm:$0xff]  ;;  %2688 = vmatpush3.msk.msra.mxu0 %vm176_vm1, %v131_v2  ;;  %v135_v10 = vld [vmem:[#allocation9 + $0x18] sm:$0xff]  ;;  %v142_v14 = vld [vmem:[%s4126_s0 + $0x28] sm:$0xff] }
  0x71   :  { %v3684_v8 = vpack.c.bf16 %v133_v6, %v132_v5  ;;  %2690 = vmatmul.mubr.msk.f32.vlgmr.msra.gmra.mrb[0].mxu0 %vm151_vm2, %v138_v4  ;;  %2961 = vmatprep.subr.bf16.mxu0 %v3468_v0  ;;  %v140_v11 = vld [vmem:[%s4126_s0 + $0x18] sm:$0xff]  ;;  %v3693_v12 = vpack.c.bf16 %v135_v10, %v134_v9  ;;  %v141_v13 = vld [vmem:[%s4126_s0 + $0x20] sm:$0xff]  ;;  %v143_v15 = vld [vmem:[%s4126_s0 + $0x30] sm:$0xff] }
  0x72   :  { %2692 = vmatprep.mubr.msk.f32.mxu0 %vm151_vm2, %v139_v7  ;;  %v144_v16 = vld [vmem:[%s4126_s0 + $0x38] sm:$0xff]  ;;  %v293_v17 = vld [vmem:[#allocation4] sm:$0xff]  ;;  %v294_v39 = vld [vmem:[#allocation7] sm:$0xff] }
  0x73   :  { %2963 = vmatpush3.bf16.msra.mxu0 %v3684_v8  ;;  %2981 = vmatpush3.bf16.msra.mxu1 %v3684_v8  ;;  %v2489_v18 = vld [vmem:[%s4131_s5] ss:$0 sm:$0xff]  ;;  %s3471_s5 = smov 64  }
  0x74   :  { %2964 = vmatprep.subr.bf16.mxu0 %v3468_v0  ;;  %2982 = vmatprep.subr.bf16.mxu1 %v3468_v0 }
  0x75   :  { %2693 = vmatmul.mubr.msk.f32.gmra.mrb[2].mxu0 %vm151_vm2, %v140_v11 }
  0x76   :  { %2695 = vmatprep.mubr.msk.f32.mxu0 %vm151_vm2, %v141_v13 }
  0x77   :  { %2966 = vmatpush3.bf16.msra.mxu0 %v3693_v12  ;;  %2984 = vmatpush3.bf16.msra.mxu1 %v3693_v12 }
  0x78   :  { %2967 = vmatprep.subr.bf16.mxu0 %v3468_v0  ;;  %2991 = vmatprep.subr.bf16.mxu1 %v3468_v0 }
  0x79   :  { %2696 = vmatmul.mubr.msk.f32.gmra.mrb[4].mxu0 %vm151_vm2, %v142_v14 }
  0x7a   :  { %2698 = vmatprep.mubr.msk.f32.mxu0 %vm151_vm2, %v143_v15 }
  0x7d   :  { %2699 = vmatmul.mubr.msk.f32.gmra.mrb[6].mxu0 %vm151_vm2, %v144_v16 }
  0x7e   :  { %2709 = vmatprep.mubr.msk.f32.mxu0 %vm3469_vm0, %v3470_v1 }
  0x81   :  { %2710 = vmatmul.mubr.msk.f32.vlgmr.msra.gmra.mrb[8].mxu0 %vm296_vm3, %v293_v17 }
  0x82   :  { %2969 = vmatpush3.bf16.msra.mxu0 %v3684_v8  ;;  %2720 = vmatprep.mubr.msk.f32.mxu0 %vm3469_vm0, %v3470_v1 }
  0x83   :  { %2970 = vmatprep.subr.bf16.mxu0 %v3468_v0 }
  0x86   :  { %2972 = vmatpush3.bf16.msra.mxu0 %v3693_v12 }
  0x87   :  { %2973 = vmatprep.subr.bf16.mxu0 %v3468_v0 }
 0x144   :  { %v2691_v19 = vpop.f32.mrb[0].mxu0 }
 0x145   :  { %v252_v20 = vadd.f32 %v2691_v19, %v2489_v18  ;;  %v246_v21 = vpop.f32.mrb[1].mxu0 }
 0x146   :  { %v247_v34 = vadd.f32 %v2489_v18, %v246_v21 }
 0x148   :  { %v2694_v22 = vpop.f32.mrb[2].mxu0 }
 0x149   :  { %v3731_v23 = vadd.f32 %v2694_v22, %v2489_v18  ;;  %v256_v24 = vpop.f32.mrb[3].mxu0 }
 0x14a   :  { %v3733_v25 = vadd.f32 %v2489_v18, %v256_v24 }
 0x14c   :  { %v2697_v26 = vpop.f32.mrb[4].mxu0 }
 0x14d   :  { %v3735_v27 = vadd.f32 %v2697_v26, %v2489_v18  ;;  %v266_v28 = vpop.f32.mrb[5].mxu0 }
 0x14e   :  { %v3737_v29 = vadd.f32 %v2489_v18, %v266_v28 }
 0x150   :  { %v2700_v30 = vpop.f32.mrb[6].mxu0 }
 0x151   :  { %v3739_v31 = vadd.f32 %v2700_v30, %v2489_v18  ;;  %v276_v32 = vpop.f32.mrb[7].mxu0 }
 0x152   :  { %v3741_v33 = vadd.f32 %v2489_v18, %v276_v32 }
 0x154   :  { %v366_v35 = vpop.f32.mrb[8].mxu0 }
 0x155   :  { %v367_v36 = vadd.f32 %v366_v35, %v247_v34  ;;  %v2711_v37 = vpop.f32.mrb[9].mxu0 }
 0x157   :  { %3122 = vtanh.f32 %v367_v36  ;;  %v2500_v40 = vmul.f32 -1.442695, %v367_v36 }
 0x159   :  { %3124 = vpow2.f32 %v2500_v40 }
 0x161   :  { %v3123_v38 = vpop.eup %3122 }
 0x162   :  { %383 = vrot.lane.b32.xlu0 %v3123_v38, %s3471_s5 }
 0x163   :  { %v3125_v41 = vpop.eup %3124 }
 0x164   :  { %v373_v42 = vadd.f32 1.0, %v3125_v41 }
 0x166   :  { %378 = vrot.lane.b32.xlu0 %v294_v39, %s3472_s28  ;;  %3126 = vrcp.f32 %v373_v42 }
 0x170   :  { %v3127_v43 = vpop.eup %3126 }
 0x1d4   :  { %v384_v44 = vpop.permute.xlu0 %383 }
 0x1d5   :  { %v386_v45 = vmul.f32 %v3127_v43, %v384_v44 }
 0x1d7   :  { %388 = vrot.lane.b32.xlu1 %v386_v45, %s3472_s28 }
 0x1d8   :  { %v379_v46 = vpop.permute.xlu0 %378 }
 0x1d9   :  { %v381_v47 = vmul.f32 %v3127_v43, %v379_v46 }
 0x249   :  { %v389_v48 = vpop.permute.xlu1 %388 }
 0x24a   :  { %v391_v49 = vadd.f32 %v389_v48, %v381_v47 }
 0x24c   :  { %3128 = vtanh.f32 %v391_v49 }
 0x256   :  { %v3129_v50 = vpop.eup %3128 }
 0x257   :  { %394 = vrot.lane.b32.xlu1 %v3129_v50, %s3471_s5 }
 0x2c9   :  { %v395_v51 = vpop.permute.xlu1 %394 }
 0x2ca   :  { %v397_v52 = vmul.f32 %v3127_v43, %v395_v51 }
 0x2cc   :  { %399 = vrot.lane.b32.xlu0 %v397_v52, %s3472_s28 }
 0x33e   :  { %v400_v53 = vpop.permute.xlu0 %399 }
 0x33f   :  { %402 = vst.msk [vmem:[#allocation2] sm:$0xff] %vm296_vm3, %v400_v53  ;;  %2721 = vmatmul.mubr.msk.f32.vlgmr.msra.gmra.mrb[10].mxu0 %vm296_vm3, %v400_v53 }
 0x340   :  { %2975 = vmatpush3.bf16.msra.mxu0 %v3684_v8  ;;  %2731 = vmatprep.mubr.msk.f32.mxu0 %vm3469_vm0, %v3470_v1 }
 0x341   :  { %2976 = vmatprep.subr.bf16.mxu0 %v3468_v0 }
 0x344   :  { %2978 = vmatpush3.bf16.msra.mxu0 %v3693_v12 }
 0x345   :  { %2985 = vmatprep.subr.bf16.mxu0 %v3468_v0 }
 0x412   :  { %v473_v54 = vpop.f32.mrb[10].mxu0 }
 0x413   :  { %v474_v55 = vadd.f32 %v473_v54, %v252_v20  ;;  %v2722_v56 = vpop.f32.mrb[11].mxu0 }
 0x415   :  { %3130 = vtanh.f32 %v474_v55  ;;  %v2502_v58 = vmul.f32 -1.442695, %v474_v55 }
 0x417   :  { %3132 = vpow2.f32 %v2502_v58 }
 0x41f   :  { %v3131_v57 = vpop.eup %3130 }
 0x420   :  { %486 = vrot.lane.b32.xlu1 %v3131_v57, %s3471_s5 }
 0x421   :  { %v3133_v59 = vpop.eup %3132 }
 0x422   :  { %v480_v60 = vadd.f32 1.0, %v3133_v59 }
 0x424   :  { %3134 = vrcp.f32 %v480_v60 }
 0x42e   :  { %v3135_v61 = vpop.eup %3134 }
 0x42f   :  { %v484_v2 = vmul.f32 %v3135_v61, %v391_v49 }
 0x492   :  { %v487_v62 = vpop.permute.xlu1 %486 }
 0x493   :  { %v489_v63 = vmul.f32 %v3135_v61, %v487_v62 }
 0x495   :  { %491 = vrot.lane.b32.xlu0 %v489_v63, %s3472_s28 }
 0x507   :  { %v492_v3 = vpop.permute.xlu0 %491 }
 0x508   :  { %v494_v4 = vadd.f32 %v492_v3, %v484_v2 }
 0x50a   :  { %3136 = vtanh.f32 %v494_v4 }
 0x514   :  { %v3137_v5 = vpop.eup %3136 }
 0x515   :  { %497 = vrot.lane.b32.xlu1 %v3137_v5, %s3471_s5 }
 0x587   :  { %v498_v6 = vpop.permute.xlu1 %497 }
 0x588   :  { %v500_v7 = vmul.f32 %v3135_v61, %v498_v6 }
 0x58a   :  { %502 = vrot.lane.b32.xlu0 %v500_v7, %s3472_s28 }
 0x5fc   :  { %v503_v9 = vpop.permute.xlu0 %502 }
 0x5fd   :  { %506 = vst.msk [vmem:[#allocation2 + $0x8] sm:$0xff] %vm296_vm3, %v503_v9  ;;  %2732 = vmatmul.mubr.msk.f32.vlgmr.msra.gmra.mrb[12].mxu0 %vm296_vm3, %v503_v9 }
 0x5fe   :  { %2987 = vmatpush3.bf16.msra.mxu0 %v3684_v8  ;;  %2753 = vmatprep.mubr.msk.f32.mxu0 %vm3469_vm0, %v3470_v1 }
 0x5ff   :  { %2988 = vmatprep.subr.bf16.mxu0 %v3468_v0 }
 0x602   :  { %2990 = vmatpush3.bf16.msra.mxu0 %v3693_v12 }
 0x603   :  { %2997 = vmatprep.subr.bf16.mxu0 %v3468_v0 }
 0x6d0   :  { %v577_v10 = vpop.f32.mrb[12].mxu0 }
 0x6d1   :  { %v578_v11 = vadd.f32 %v577_v10, %v3733_v25  ;;  %v2733_v13 = vpop.f32.mrb[13].mxu0 }
 0x6d3   :  { %3138 = vtanh.f32 %v578_v11  ;;  %v2504_v15 = vmul.f32 -1.442695, %v578_v11 }
 0x6d5   :  { %3140 = vpow2.f32 %v2504_v15 }
 0x6dd   :  { %v3139_v14 = vpop.eup %3138 }
 0x6de   :  { %590 = vrot.lane.b32.xlu1 %v3139_v14, %s3471_s5 }
 0x6df   :  { %v3141_v16 = vpop.eup %3140 }
 0x6e0   :  { %v584_v17 = vadd.f32 1.0, %v3141_v16  ;;  %v1138_v16 = vld [vmem:[#allocation10 + $0x8] sm:$0xff] }
 0x6e2   :  { %3142 = vrcp.f32 %v584_v17 }
 0x6ec   :  { %v3143_v18 = vpop.eup %3142 }
 0x6ed   :  { %v588_v21 = vmul.f32 %v3143_v18, %v494_v4 }
 0x750   :  { %v591_v19 = vpop.permute.xlu1 %590 }
 0x751   :  { %v593_v20 = vmul.f32 %v3143_v18, %v591_v19 }
 0x753   :  { %595 = vrot.lane.b32.xlu0 %v593_v20, %s3472_s28 }
 0x7c5   :  { %v596_v22 = vpop.permute.xlu0 %595 }
 0x7c6   :  { %v598_v24 = vadd.f32 %v596_v22, %v588_v21  ;;  %v1139_v21 = vld [vmem:[#allocation10 + $0x10] sm:$0xff]  ;;  %v1140_v22 = vld [vmem:[#allocation10 + $0x18] sm:$0xff] }
 0x7c8   :  { %3144 = vtanh.f32 %v598_v24 }
 0x7d2   :  { %v3145_v25 = vpop.eup %3144 }
 0x7d3   :  { %601 = vrot.lane.b32.xlu1 %v3145_v25, %s3471_s5 }
 0x845   :  { %v602_v26 = vpop.permute.xlu1 %601 }
 0x846   :  { %v604_v28 = vmul.f32 %v3143_v18, %v602_v26  ;;  %v1146_v26 = vld [vmem:[#allocation2] sm:$0xff] }
 0x848   :  { %606 = vrot.lane.b32.xlu0 %v604_v28, %s3472_s28  ;;  %v1147_v28 = vld [vmem:[#allocation2 + $0x8] sm:$0xff] }
 0x8ba   :  { %v607_v30 = vpop.permute.xlu0 %606 }
 0x8bb   :  { %610 = vst.msk [vmem:[#allocation2 + $0x10] sm:$0xff] %vm296_vm3, %v607_v30  ;;  %2743 = vmatmul.mubr.msk.f32.vlgmr.msra.gmra.mrb[0].mxu1 %vm296_vm3, %v607_v30 }
 0x8bc   :  { %2993 = vmatpush3.bf16.msra.mxu1 %v3684_v8  ;;  %2764 = vmatprep.mubr.msk.f32.mxu1 %vm3469_vm0, %v3470_v1 }
 0x8bd   :  { %2994 = vmatprep.subr.bf16.mxu1 %v3468_v0 }
 0x8c0   :  { %2996 = vmatpush3.bf16.msra.mxu1 %v3693_v12 }
 0x8c1   :  { %3003 = vmatprep.subr.bf16.mxu1 %v3468_v0 }
 0x8c2   :  { %v1148_v30 = vld [vmem:[#allocation2 + $0x10] sm:$0xff] }
 0x98e   :  { %v681_v32 = vpop.f32.mrb[0].mxu1 }
 0x98f   :  { %v682_v34 = vadd.f32 %v681_v32, %v3731_v23  ;;  %v2744_v35 = vpop.f32.mrb[1].mxu1 }
 0x991   :  { %3146 = vtanh.f32 %v682_v34  ;;  %v2506_v37 = vmul.f32 -1.442695, %v682_v34 }
 0x993   :  { %3148 = vpow2.f32 %v2506_v37 }
 0x99b   :  { %v3147_v36 = vpop.eup %3146 }
 0x99c   :  { %694 = vrot.lane.b32.xlu1 %v3147_v36, %s3471_s5 }
 0x99d   :  { %v3149_v38 = vpop.eup %3148 }
 0x99e   :  { %v688_v39 = vadd.f32 1.0, %v3149_v38 }
 0x9a0   :  { %3150 = vrcp.f32 %v688_v39 }
 0x9aa   :  { %v3151_v40 = vpop.eup %3150 }
 0x9ab   :  { %v692_v43 = vmul.f32 %v3151_v40, %v598_v24  ;;  %v3013_v24 = vpack.c.bf16 %v1140_v22, %v1139_v21 }
 0xa0e   :  { %v695_v41 = vpop.permute.xlu1 %694 }
 0xa0f   :  { %v697_v42 = vmul.f32 %v3151_v40, %v695_v41 }
 0xa11   :  { %699 = vrot.lane.b32.xlu0 %v697_v42, %s3472_s28 }
 0xa83   :  { %v700_v44 = vpop.permute.xlu0 %699 }
 0xa84   :  { %v702_v45 = vadd.f32 %v700_v44, %v692_v43 }
 0xa86   :  { %3152 = vtanh.f32 %v702_v45 }
 0xa90   :  { %v3153_v23 = vpop.eup %3152 }
 0xa91   :  { %705 = vrot.lane.b32.xlu1 %v3153_v23, %s3471_s5 }
 0xb03   :  { %v706_v46 = vpop.permute.xlu1 %705 }
 0xb04   :  { %v708_v47 = vmul.f32 %v3151_v40, %v706_v46 }
 0xb06   :  { %710 = vrot.lane.b32.xlu0 %v708_v47, %s3472_s28 }
 0xb78   :  { %v711_v48 = vpop.permute.xlu0 %710 }
 0xb79   :  { %714 = vst.msk [vmem:[#allocation2 + $0x18] sm:$0xff] %vm296_vm3, %v711_v48  ;;  %2754 = vmatmul.mubr.msk.f32.vlgmr.msra.gmra.mrb[14].mxu0 %vm296_vm3, %v711_v48 }
 0xb7a   :  { %2999 = vmatpush3.bf16.msra.mxu0 %v3684_v8  ;;  %2775 = vmatprep.mubr.msk.f32.mxu0 %vm3469_vm0, %v3470_v1 }
 0xb7b   :  { %3000 = vmatprep.subr.bf16.mxu0 %v3468_v0 }
 0xb7e   :  { %3002 = vmatpush3.bf16.msra.mxu0 %v3693_v12 }
 0xb80   :  { %v1149_v32 = vld [vmem:[#allocation2 + $0x18] sm:$0xff] }
 0xc4c   :  { %v785_v49 = vpop.f32.mrb[14].mxu0 }
 0xc4d   :  { %v786_v50 = vadd.f32 %v785_v49, %v3737_v29  ;;  %v2755_v51 = vpop.f32.mrb[15].mxu0 }
 0xc4f   :  { %3154 = vtanh.f32 %v786_v50  ;;  %v2508_v53 = vmul.f32 -1.442695, %v786_v50 }
 0xc51   :  { %3156 = vpow2.f32 %v2508_v53 }
 0xc59   :  { %v3155_v52 = vpop.eup %3154 }
 0xc5a   :  { %798 = vrot.lane.b32.xlu1 %v3155_v52, %s3471_s5 }
 0xc5b   :  { %v3157_v54 = vpop.eup %3156 }
 0xc5c   :  { %v792_v55 = vadd.f32 1.0, %v3157_v54  ;;  %v1141_v54 = vld [vmem:[#allocation12] sm:$0xff] }
 0xc5e   :  { %3158 = vrcp.f32 %v792_v55  ;;  %v1142_v55 = vld [vmem:[#allocation12 + $0x8] sm:$0xff] }
 0xc68   :  { %v3159_v56 = vpop.eup %3158 }
 0xc69   :  { %v796_v59 = vmul.f32 %v3159_v56, %v702_v45 }
 0xccc   :  { %v799_v57 = vpop.permute.xlu1 %798 }
 0xccd   :  { %v801_v58 = vmul.f32 %v3159_v56, %v799_v57  ;;  %v1143_v57 = vld [vmem:[#allocation12 + $0x10] sm:$0xff] }
 0xccf   :  { %803 = vrot.lane.b32.xlu0 %v801_v58, %s3472_s28  ;;  %v1144_v58 = vld [vmem:[#allocation12 + $0x18] sm:$0xff] }
 0xd41   :  { %v804_v60 = vpop.permute.xlu0 %803 }
 0xd42   :  { %v806_v61 = vadd.f32 %v804_v60, %v796_v59  ;;  %v3841_v59 = vpack.c.bf16 %v1144_v58, %v1143_v57 }
 0xd44   :  { %3160 = vtanh.f32 %v806_v61 }
 0xd4e   :  { %v3161_v29 = vpop.eup %3160 }
 0xd4f   :  { %809 = vrot.lane.b32.xlu1 %v3161_v29, %s3471_s5  ;;  %v1300_v29 = vld [vmem:[#allocation7 + $0x8] sm:$0xff] }
 0xdc1   :  { %v810_v62 = vpop.permute.xlu1 %809 }
 0xdc2   :  { %v812_v63 = vmul.f32 %v3159_v56, %v810_v62  ;;  %v3837_v56 = vpack.c.bf16 %v1142_v55, %v1141_v54 }
 0xdc4   :  { %814 = vrot.lane.b32.xlu0 %v812_v63, %s3472_s28  ;;  %v1298_v63 = vld [vmem:[#allocation4 + $0x8] sm:$0xff] }
 0xe36   :  { %v815_v2 = vpop.permute.xlu0 %814 }
 0xe37   :  { %818 = vst.msk [vmem:[#allocation2 + $0x20] sm:$0xff] %vm296_vm3, %v815_v2  ;;  %2765 = vmatmul.mubr.msk.f32.vlgmr.msra.gmra.mrb[2].mxu1 %vm296_vm3, %v815_v2 }
 0xe38   :  { %3005 = vmatpush3.bf16.msra.mxu1 %v3684_v8  ;;  %2786 = vmatprep.mubr.msk.f32.mxu1 %vm3469_vm0, %v3470_v1 }
 0xe39   :  { %3006 = vmatprep.subr.bf16.mxu1 %v3468_v0 }
 0xe3c   :  { %3008 = vmatpush3.bf16.msra.mxu1 %v3693_v12 }
 0xe3d   :  { %3017 = vmatprep.subr.bf16.mxu1 %v3468_v0 }
 0xe3e   :  { %v1150_v34 = vld [vmem:[#allocation2 + $0x20] sm:$0xff] }
 0xf0a   :  { %v889_v3 = vpop.f32.mrb[2].mxu1 }
 0xf0b   :  { %v890_v4 = vadd.f32 %v889_v3, %v3735_v27  ;;  %v2766_v5 = vpop.f32.mrb[3].mxu1  ;;  %v1137_v27 = vld [vmem:[#allocation10] sm:$0xff] }
 0xf0c   :  { %v3009_v17 = vpack.c.bf16 %v1138_v16, %v1137_v27 }
 0xf0d   :  { %3162 = vtanh.f32 %v890_v4  ;;  %v2510_v7 = vmul.f32 -1.442695, %v890_v4 }
 0xf0e   :  { %3010 = vmatprep.subr.bf16.mxu0 %v3009_v17 }
 0xf0f   :  { %3164 = vpow2.f32 %v2510_v7 }
 0xf17   :  { %v3163_v6 = vpop.eup %3162 }
 0xf18   :  { %902 = vrot.lane.b32.xlu1 %v3163_v6, %s3471_s5  ;;  %v3867_v6 = vld [vmem:[%s4134_s8] ss:$0 sm:$0xff] }
 0xf19   :  { %v3165_v8 = vpop.eup %3164 }
 0xf1a   :  { %v896_v9 = vadd.f32 1.0, %v3165_v8 }
 0xf1c   :  { %3166 = vrcp.f32 %v896_v9 }
 0xf26   :  { %v3167_v10 = vpop.eup %3166 }
 0xf27   :  { %v900_v12 = vmul.f32 %v3167_v10, %v806_v61 }
 0xf8a   :  { %v903_v11 = vpop.permute.xlu1 %902 }
 0xf8b   :  { %v905_v13 = vmul.f32 %v3167_v10, %v903_v11 }
 0xf8d   :  { %907 = vrot.lane.b32.xlu0 %v905_v13, %s3472_s28 }
 0xfff   :  { %v908_v14 = vpop.permute.xlu0 %907 }
0x1000   :  { %v910_v15 = vadd.f32 %v908_v14, %v900_v12 }
0x1002   :  { %3168 = vtanh.f32 %v910_v15 }
0x100c   :  { %v3169_v18 = vpop.eup %3168 }
0x100d   :  { %913 = vrot.lane.b32.xlu1 %v3169_v18, %s3471_s5 }
0x107f   :  { %v914_v19 = vpop.permute.xlu1 %913 }
0x1080   :  { %v916_v20 = vmul.f32 %v3167_v10, %v914_v19 }
0x1082   :  { %918 = vrot.lane.b32.xlu0 %v916_v20, %s3472_s28 }
0x10f4   :  { %v919_v25 = vpop.permute.xlu0 %918 }
0x10f5   :  { %922 = vst.msk [vmem:[#allocation2 + $0x28] sm:$0xff] %vm296_vm3, %v919_v25  ;;  %2776 = vmatmul.mubr.msk.f32.vlgmr.msra.gmra.mrb[16].mxu0 %vm296_vm3, %v919_v25 }
0x10f6   :  { %3012 = vmatpush3.bf16.msra.mxu0 %v3009_v17  ;;  %2797 = vmatprep.mubr.msk.f32.mxu0 %vm296_vm3, %v1146_v26 }
0x10f7   :  { %3014 = vmatprep.subr.bf16.mxu0 %v3013_v24 }
0x10fa   :  { %3016 = vmatpush3.bf16.msra.mxu0 %v3013_v24 }
0x10fb   :  { %3029 = vmatprep.subr.bf16.mxu0 %v3468_v0 }
0x10fc   :  { %v1151_v35 = vld [vmem:[#allocation2 + $0x28] sm:$0xff] }
0x10fd   :  { %2798 = vmatmul.mubr.msk.f32.vlgmr.msra.gmra.mrb[18].mxu0 %vm296_vm3, %v1147_v28 }
0x10fe   :  { %2800 = vmatprep.mubr.msk.f32.mxu0 %vm296_vm3, %v1148_v30  ;;  %3031 = vmatpush3.bf16.msra.mxu0 %v3837_v56 }
0x10ff   :  { %3032 = vmatprep.subr.bf16.mxu0 %v3468_v0 }
0x1101   :  { %2801 = vmatmul.mubr.msk.f32.gmra.mrb[20].mxu0 %vm296_vm3, %v1149_v32 }
0x1102   :  { %2803 = vmatprep.mubr.msk.f32.mxu0 %vm296_vm3, %v1150_v34  ;;  %3034 = vmatpush3.bf16.msra.mxu0 %v3841_v59 }
0x1103   :  { %3041 = vmatprep.subr.bf16.mxu0 %v3468_v0 }
0x1105   :  { %2804 = vmatmul.mubr.msk.f32.gmra.mrb[22].mxu0 %vm296_vm3, %v1151_v35 }
0x11c8   :  { %v993_v36 = vpop.f32.mrb[16].mxu0 }
0x11c9   :  { %v994_v37 = vadd.f32 %v993_v36, %v3741_v33  ;;  %v2777_v38 = vpop.f32.mrb[17].mxu0 }
0x11cb   :  { %3170 = vtanh.f32 %v994_v37  ;;  %v2512_v23 = vmul.f32 -1.442695, %v994_v37 }
0x11cd   :  { %3172 = vpow2.f32 %v2512_v23 }
0x11d0   :  { %v3821_v39 = vpop.f32.mrb[18].mxu0 }
0x11d1   :  { %v1250_v40 = vpop.f32.mrb[19].mxu0 }
0x11d2   :  { %v1251_v7 = vadd.f32 %v3867_v6, %v1250_v40 }
0x11d4   :  { %v3823_v41 = vpop.f32.mrb[20].mxu0 }
0x11d5   :  { %v3171_v42 = vpop.eup %3170  ;;  %v3825_v43 = vpop.f32.mrb[21].mxu0 }
0x11d6   :  { %1006 = vrot.lane.b32.xlu1 %v3171_v42, %s3471_s5 }
0x11d7   :  { %v3173_v46 = vpop.eup %3172 }
0x11d8   :  { %v3828_v44 = vpop.f32.mrb[22].mxu0  ;;  %v1000_v33 = vadd.f32 1.0, %v3173_v46  ;;  %v1256_v46 = vadd.f32 %v3821_v39, %v3867_v6 }
0x11d9   :  { %v3830_v45 = vpop.f32.mrb[23].mxu0 }
0x11da   :  { %3174 = vrcp.f32 %v1000_v33 }
0x11e4   :  { %v3175_v47 = vpop.eup %3174 }
0x11e5   :  { %v1004_v50 = vmul.f32 %v3175_v47, %v910_v15 }
0x1248   :  { %v1007_v48 = vpop.permute.xlu1 %1006 }
0x1249   :  { %v1009_v49 = vmul.f32 %v3175_v47, %v1007_v48 }
0x124b   :  { %1011 = vrot.lane.b32.xlu0 %v1009_v49, %s3472_s28 }
0x12bd   :  { %v1012_v51 = vpop.permute.xlu0 %1011 }
0x12be   :  { %v3833_v52 = vadd.f32 %v1012_v51, %v1004_v50 }
0x12c0   :  { %3176 = vtanh.f32 %v3833_v52 }
0x12ca   :  { %v3177_v53 = vpop.eup %3176 }
0x12cb   :  { %1017 = vrot.lane.b32.xlu1 %v3177_v53, %s3471_s5 }
0x133d   :  { %v1018_v60 = vpop.permute.xlu1 %1017 }
0x133e   :  { %v1020_v61 = vmul.f32 %v3175_v47, %v1018_v60 }
0x1340   :  { %1022 = vrot.lane.b32.xlu0 %v1020_v61, %s3472_s28 }
0x1344   :  { %1383 = vrot.lane.b32.xlu0 %v1300_v29, %s3472_s28 }
0x13b2   :  { %v1023_v62 = vpop.permute.xlu0 %1022 }
0x13b3   :  { %1026 = vst.msk [vmem:[#allocation2 + $0x30] sm:$0xff] %vm296_vm3, %v1023_v62  ;;  %2787 = vmatmul.mubr.msk.f32.vlgmr.msra.gmra.mrb[4].mxu1 %vm296_vm3, %v1023_v62 }
0x13b4   :  { %3019 = vmatpush3.bf16.msra.mxu1 %v3837_v56  ;;  %2817 = vmatprep.mubr.msk.f32.mxu1 %vm3469_vm0, %v3470_v1 }
0x13b5   :  { %3020 = vmatprep.subr.bf16.mxu1 %v3468_v0 }
0x13b6   :  { %v1384_v16 = vpop.permute.xlu0 %1383 }
0x13b8   :  { %3022 = vmatpush3.bf16.msra.mxu1 %v3841_v59 }
0x13b9   :  { %3023 = vmatprep.subr.bf16.mxu1 %v3468_v0 }
0x13ba   :  { %v1152_v2 = vld [vmem:[#allocation2 + $0x30] sm:$0xff] }
0x13bb   :  { %2818 = vmatmul.mubr.msk.f32.vlgmr.msra.gmra.mrb[6].mxu1 %vm296_vm3, %v1298_v63  ;;  %2806 = vmatprep.mubr.msk.f32.mxu0 %vm296_vm3, %v1152_v2 }
0x13bc   :  { %3025 = vmatpush3.bf16.msra.mxu1 %v3837_v56  ;;  %2828 = vmatprep.mubr.msk.f32.mxu1 %vm3469_vm0, %v3470_v1 }
0x13bd   :  { %3026 = vmatprep.subr.bf16.mxu1 %v3468_v0 }
0x13c0   :  { %3028 = vmatpush3.bf16.msra.mxu1 %v3841_v59 }
0x13c1   :  { %3035 = vmatprep.subr.bf16.mxu1 %v3468_v0 }
0x1486   :  { %v1097_v3 = vpop.f32.mrb[4].mxu1 }
0x1487   :  { %v1098_v4 = vadd.f32 %v1097_v3, %v3739_v31  ;;  %v2788_v5 = vpop.f32.mrb[5].mxu1 }
0x1488   :  { %v1261_v5 = vadd.f32 %v3867_v6, %v3825_v43 }
0x1489   :  { %v2514_v22 = vmul.f32 -1.442695, %v1098_v4 }
0x148e   :  { %v1371_v8 = vpop.f32.mrb[6].mxu1 }
0x148f   :  { %v1372_v9 = vadd.f32 %v1371_v8, %v1251_v7  ;;  %v2819_v10 = vpop.f32.mrb[7].mxu1 }
0x1491   :  { %3178 = vtanh.f32 %v1372_v9  ;;  %v2525_v13 = vmul.f32 -1.442695, %v1372_v9 }
0x1493   :  { %3180 = vpow2.f32 %v2525_v13 }
0x149b   :  { %v3179_v11 = vpop.eup %3178 }
0x149c   :  { %1388 = vrot.lane.b32.xlu1 %v3179_v11, %s3471_s5 }
0x149d   :  { %v3181_v12 = vpop.eup %3180 }
0x149e   :  { %v1378_v14 = vadd.f32 1.0, %v3181_v12 }
0x14a0   :  { %3182 = vrcp.f32 %v1378_v14 }
0x14aa   :  { %v3183_v31 = vpop.eup %3182 }
0x14ab   :  { %v1386_v17 = vmul.f32 %v3183_v31, %v1384_v16 }
0x150e   :  { %v1389_v15 = vpop.permute.xlu1 %1388 }
0x150f   :  { %v1391_v27 = vmul.f32 %v3183_v31, %v1389_v15 }
0x1511   :  { %1393 = vrot.lane.b32.xlu1 %v1391_v27, %s3472_s28 }
0x1583   :  { %v1394_v18 = vpop.permute.xlu1 %1393 }
0x1584   :  { %v1396_v19 = vadd.f32 %v1394_v18, %v1386_v17 }
0x1586   :  { %3184 = vtanh.f32 %v1396_v19 }
0x1587   :  { %3186 = vtanh.f32 %v1098_v4 }
0x1588   :  { %3188 = vpow2.f32 %v2514_v22 }
0x1590   :  { %v3185_v20 = vpop.eup %3184 }
0x1591   :  { %1399 = vrot.lane.b32.xlu0 %v3185_v20, %s3471_s5  ;;  %v3187_v21 = vpop.eup %3186 }
0x1592   :  { %v3189_v24 = vpop.eup %3188 }
0x1593   :  { %v1104_v25 = vadd.f32 1.0, %v3189_v24 }
0x1595   :  { %1110 = vrot.lane.b32.xlu0 %v3187_v21, %s3471_s5  ;;  %3190 = vrcp.f32 %v1104_v25  ;;  %v1266_v21 = vadd.f32 %v3823_v41, %v3867_v6 }
0x159f   :  { %v3191_v30 = vpop.eup %3190 }
0x15a0   :  { %v1108_v36 = vmul.f32 %v3191_v30, %v3833_v52 }
0x1603   :  { %v1400_v26 = vpop.permute.xlu0 %1399 }
0x1604   :  { %v1402_v28 = vmul.f32 %v3183_v31, %v1400_v26 }
0x1606   :  { %1404 = vrot.lane.b32.xlu1 %v1402_v28, %s3472_s28 }
0x1607   :  { %v1111_v32 = vpop.permute.xlu0 %1110 }
0x1608   :  { %v1113_v34 = vmul.f32 %v3191_v30, %v1111_v32 }
0x160a   :  { %1115 = vrot.lane.b32.xlu0 %v1113_v34, %s3472_s28 }
0x1678   :  { %v1405_v35 = vpop.permute.xlu1 %1404 }
0x1679   :  { %1407 = vst.msk [vmem:[#allocation2] sm:$0xff] %vm296_vm3, %v1405_v35  ;;  %2829 = vmatmul.mubr.msk.f32.vlgmr.msra.gmra.mrb[8].mxu1 %vm296_vm3, %v1405_v35 }
0x167a   :  { %3037 = vmatpush3.bf16.msra.mxu1 %v3837_v56  ;;  %2850 = vmatprep.mubr.msk.f32.mxu1 %vm3469_vm0, %v3470_v1 }
0x167b   :  { %3038 = vmatprep.subr.bf16.mxu1 %v3468_v0 }
0x167c   :  { %v1116_v37 = vpop.permute.xlu0 %1115 }
0x167d   :  { %v3883_v38 = vadd.f32 %v1116_v37, %v1108_v36 }
0x167e   :  { %3040 = vmatpush3.bf16.msra.mxu1 %v3841_v59 }
0x167f   :  { %3192 = vtanh.f32 %v3883_v38  ;;  %3047 = vmatprep.subr.bf16.mxu1 %v3468_v0 }
0x1689   :  { %v3193_v40 = vpop.eup %3192 }
0x168a   :  { %1121 = vrot.lane.b32.xlu0 %v3193_v40, %s3471_s5 }
0x16fc   :  { %v1122_v42 = vpop.permute.xlu0 %1121 }
0x16fd   :  { %v1124_v23 = vmul.f32 %v3191_v30, %v1122_v42 }
0x16ff   :  { %1126 = vrot.lane.b32.xlu0 %v1124_v23, %s3472_s28 }
0x174c   :  { %v1477_v33 = vpop.f32.mrb[8].mxu1 }
0x174d   :  { %v1478_v47 = vadd.f32 %v1477_v33, %v1256_v46  ;;  %v2830_v48 = vpop.f32.mrb[9].mxu1 }
0x174f   :  { %3194 = vtanh.f32 %v1478_v47  ;;  %v2527_v52 = vmul.f32 -1.442695, %v1478_v47  ;;  %v1271_v47 = vadd.f32 %v3867_v6, %v3830_v45 }
0x1751   :  { %3196 = vpow2.f32 %v2527_v52 }
0x1759   :  { %v3195_v49 = vpop.eup %3194 }
0x175a   :  { %1490 = vrot.lane.b32.xlu1 %v3195_v49, %s3471_s5 }
0x175b   :  { %v3197_v39 = vpop.eup %3196 }
0x175c   :  { %v1484_v53 = vadd.f32 1.0, %v3197_v39 }
0x175e   :  { %3198 = vrcp.f32 %v1484_v53 }
0x1768   :  { %v3199_v54 = vpop.eup %3198 }
0x1769   :  { %v1488_v58 = vmul.f32 %v3199_v54, %v1396_v19 }
0x1771   :  { %v1127_v50 = vpop.permute.xlu0 %1126 }
0x1772   :  { %1130 = vst.msk [vmem:[#allocation2 + $0x38] sm:$0xff] %vm296_vm3, %v1127_v50  ;;  %1131 = vst.msk [vmem:[#allocation16] sm:$0xff] %vm296_vm3, %v1127_v50 }
0x1779   :  { %v1153_v51 = vld [vmem:[#allocation2 + $0x38] sm:$0xff] }
0x177a   :  { %2807 = vmatmul.mubr.msk.f32.gmra.mrb[24].mxu0 %vm296_vm3, %v1153_v51 }
0x177b   :  { %2839 = vmatprep.mubr.msk.f32.mxu0 %vm3469_vm0, %v3470_v1 }
0x17cc   :  { %v1491_v55 = vpop.permute.xlu1 %1490 }
0x17cd   :  { %v1493_v57 = vmul.f32 %v3199_v54, %v1491_v55 }
0x17cf   :  { %1495 = vrot.lane.b32.xlu1 %v1493_v57, %s3472_s28 }
0x1841   :  { %v1496_v60 = vpop.permute.xlu1 %1495 }
0x1842   :  { %v1498_v61 = vadd.f32 %v1496_v60, %v1488_v58 }
0x1844   :  { %3200 = vtanh.f32 %v1498_v61 }
0x184d   :  { %v3899_v29 = vpop.f32.mrb[24].mxu0 }
0x184e   :  { %v3201_v62 = vpop.eup %3200  ;;  %v3901_v63 = vpop.f32.mrb[25].mxu0 }
0x184f   :  { %1501 = vrot.lane.b32.xlu1 %v3201_v62, %s3471_s5 }
0x18c1   :  { %v1502_v2 = vpop.permute.xlu1 %1501 }
0x18c2   :  { %v1504_v3 = vmul.f32 %v3199_v54, %v1502_v2 }
0x18c4   :  { %1506 = vrot.lane.b32.xlu1 %v1504_v3, %s3472_s28 }
0x1936   :  { %v1507_v4 = vpop.permute.xlu1 %1506 }
0x1937   :  { %1509 = vst.msk [vmem:[#allocation2 + $0x8] sm:$0xff] %vm296_vm3, %v1507_v4  ;;  %2840 = vmatmul.mubr.msk.f32.vlgmr.msra.gmra.mrb[26].mxu0 %vm296_vm3, %v1507_v4  ;;  %v1276_v4 = vadd.f32 %v3828_v44, %v3867_v6 }
0x1938   :  { %3043 = vmatpush3.bf16.msra.mxu0 %v3837_v56  ;;  %2861 = vmatprep.mubr.msk.f32.mxu0 %vm3469_vm0, %v3470_v1 }
0x1939   :  { %3044 = vmatprep.subr.bf16.mxu0 %v3468_v0 }
0x193c   :  { %3046 = vmatpush3.bf16.msra.mxu0 %v3841_v59 }
0x193d   :  { %3053 = vmatprep.subr.bf16.mxu0 %v3468_v0 }
0x1a0a   :  { %v1579_v7 = vpop.f32.mrb[26].mxu0 }
0x1a0b   :  { %v1580_v8 = vadd.f32 %v1579_v7, %v1261_v5  ;;  %v2841_v9 = vpop.f32.mrb[27].mxu0 }
0x1a0d   :  { %3202 = vtanh.f32 %v1580_v8  ;;  %v2529_v11 = vmul.f32 -1.442695, %v1580_v8 }
0x1a0f   :  { %3204 = vpow2.f32 %v2529_v11 }
0x1a17   :  { %v3203_v10 = vpop.eup %3202 }
0x1a18   :  { %1592 = vrot.lane.b32.xlu0 %v3203_v10, %s3471_s5 }
0x1a19   :  { %v3205_v13 = vpop.eup %3204 }
0x1a1a   :  { %v1586_v12 = vadd.f32 1.0, %v3205_v13 }
0x1a1c   :  { %3206 = vrcp.f32 %v1586_v12 }
0x1a26   :  { %v3207_v14 = vpop.eup %3206 }
0x1a27   :  { %v1590_v27 = vmul.f32 %v3207_v14, %v1498_v61 }
0x1a8a   :  { %v1593_v31 = vpop.permute.xlu0 %1592 }
0x1a8b   :  { %v1595_v15 = vmul.f32 %v3207_v14, %v1593_v31  ;;  %v2139_v31 = vld [vmem:[#allocation13 + $0x8] sm:$0xff] }
0x1a8d   :  { %1597 = vrot.lane.b32.xlu1 %v1595_v15, %s3472_s28 }
0x1aff   :  { %v1598_v16 = vpop.permute.xlu1 %1597 }
0x1b00   :  { %v1600_v43 = vadd.f32 %v1598_v16, %v1590_v27 }
0x1b02   :  { %3208 = vtanh.f32 %v1600_v43 }
0x1b0c   :  { %v3209_v17 = vpop.eup %3208 }
0x1b0d   :  { %1603 = vrot.lane.b32.xlu0 %v3209_v17, %s3471_s5  ;;  %v2140_v17 = vld [vmem:[#allocation13 + $0x10] sm:$0xff] }
0x1b7f   :  { %v1604_v18 = vpop.permute.xlu0 %1603 }
0x1b80   :  { %v1606_v19 = vmul.f32 %v3207_v14, %v1604_v18  ;;  %v2138_v14 = vld [vmem:[#allocation13] sm:$0xff]  ;;  %v2141_v18 = vld [vmem:[#allocation13 + $0x18] sm:$0xff] }
0x1b81   :  { %v3065_v15 = vpack.c.bf16 %v2139_v31, %v2138_v14  ;;  %v2313_v14 = vld [vmem:[%s4137_s11 + $0x58] sm:$0xff] }
0x1b82   :  { %1608 = vrot.lane.b32.xlu1 %v1606_v19, %s3472_s28  ;;  %v3069_v19 = vpack.c.bf16 %v2141_v18, %v2140_v17  ;;  %v2317_v17 = vld [vmem:[%s4137_s11 + $0x78] sm:$0xff] }
0x1bf4   :  { %v1609_v20 = vpop.permute.xlu1 %1608 }
0x1bf5   :  { %1611 = vst.msk [vmem:[#allocation2 + $0x10] sm:$0xff] %vm296_vm3, %v1609_v20  ;;  %2851 = vmatmul.mubr.msk.f32.vlgmr.msra.gmra.mrb[10].mxu1 %vm296_vm3, %v1609_v20 }
0x1bf6   :  { %3049 = vmatpush3.bf16.msra.mxu1 %v3837_v56  ;;  %2872 = vmatprep.mubr.msk.f32.mxu1 %vm3469_vm0, %v3470_v1 }
0x1bf7   :  { %3050 = vmatprep.subr.bf16.mxu1 %v3468_v0 }
0x1bfa   :  { %3052 = vmatpush3.bf16.msra.mxu1 %v3841_v59 }
0x1bfb   :  { %3059 = vmatprep.subr.bf16.mxu1 %v3468_v0 }
0x1cc8   :  { %v1681_v22 = vpop.f32.mrb[10].mxu1 }
0x1cc9   :  { %v1682_v24 = vadd.f32 %v1681_v22, %v1266_v21  ;;  %v2852_v25 = vpop.f32.mrb[11].mxu1  ;;  %v2130_v21 = vld [vmem:[#allocation2] sm:$0xff]  ;;  %v2131_v22 = vld [vmem:[#allocation2 + $0x8] sm:$0xff] }
0x1ccb   :  { %3210 = vtanh.f32 %v1682_v24  ;;  %v2531_v28 = vmul.f32 -1.442695, %v1682_v24  ;;  %v2132_v24 = vld [vmem:[#allocation2 + $0x10] sm:$0xff] }
0x1ccd   :  { %3212 = vpow2.f32 %v2531_v28 }
0x1cd5   :  { %v3211_v26 = vpop.eup %3210 }
0x1cd6   :  { %1694 = vrot.lane.b32.xlu0 %v3211_v26, %s3471_s5 }
0x1cd7   :  { %v3213_v30 = vpop.eup %3212 }
0x1cd8   :  { %v1688_v32 = vadd.f32 1.0, %v3213_v30  ;;  %v1281_v30 = vadd.f32 %v3867_v6, %v3901_v63 }
0x1cda   :  { %3214 = vrcp.f32 %v1688_v32 }
0x1ce4   :  { %v3215_v34 = vpop.eup %3214 }
0x1ce5   :  { %v1692_v37 = vmul.f32 %v3215_v34, %v1600_v43 }
0x1d48   :  { %v1695_v35 = vpop.permute.xlu0 %1694 }
0x1d49   :  { %v1697_v36 = vmul.f32 %v3215_v34, %v1695_v35 }
0x1d4b   :  { %1699 = vrot.lane.b32.xlu1 %v1697_v36, %s3472_s28 }
0x1dbd   :  { %v1700_v40 = vpop.permute.xlu1 %1699 }
0x1dbe   :  { %v1702_v41 = vadd.f32 %v1700_v40, %v1692_v37 }
0x1dc0   :  { %3216 = vtanh.f32 %v1702_v41 }
0x1dca   :  { %v3217_v42 = vpop.eup %3216 }
0x1dcb   :  { %1705 = vrot.lane.b32.xlu0 %v3217_v42, %s3471_s5 }
0x1e3d   :  { %v1706_v23 = vpop.permute.xlu0 %1705 }
0x1e3e   :  { %v1708_v46 = vmul.f32 %v3215_v34, %v1706_v23 }
0x1e40   :  { %1710 = vrot.lane.b32.xlu1 %v1708_v46, %s3472_s28 }
0x1eb2   :  { %v1711_v33 = vpop.permute.xlu1 %1710 }
0x1eb3   :  { %1713 = vst.msk [vmem:[#allocation2 + $0x18] sm:$0xff] %vm296_vm3, %v1711_v33  ;;  %2862 = vmatmul.mubr.msk.f32.vlgmr.msra.gmra.mrb[28].mxu0 %vm296_vm3, %v1711_v33 }
0x1eb4   :  { %3055 = vmatpush3.bf16.msra.mxu0 %v3837_v56  ;;  %2883 = vmatprep.mubr.msk.f32.mxu0 %vm3469_vm0, %v3470_v1 }
0x1eb5   :  { %3056 = vmatprep.subr.bf16.mxu0 %v3468_v0 }
0x1eb8   :  { %3058 = vmatpush3.bf16.msra.mxu0 %v3841_v59 }
0x1eb9   :  { %3066 = vmatprep.subr.bf16.mxu0 %v3065_v15 }
0x1eba   :  { %v2133_v25 = vld [vmem:[#allocation2 + $0x18] sm:$0xff] }
0x1f86   :  { %v1783_v48 = vpop.f32.mrb[28].mxu0 }
0x1f87   :  { %v1784_v49 = vadd.f32 %v1783_v48, %v1271_v47  ;;  %v2863_v50 = vpop.f32.mrb[29].mxu0 }
0x1f89   :  { %3218 = vtanh.f32 %v1784_v49  ;;  %v2533_v52 = vmul.f32 -1.442695, %v1784_v49 }
0x1f8b   :  { %3220 = vpow2.f32 %v2533_v52 }
0x1f93   :  { %v3219_v51 = vpop.eup %3218 }
0x1f94   :  { %1796 = vrot.lane.b32.xlu0 %v3219_v51, %s3471_s5 }
0x1f95   :  { %v3221_v39 = vpop.eup %3220 }
0x1f96   :  { %v1790_v53 = vadd.f32 1.0, %v3221_v39 }
0x1f98   :  { %3222 = vrcp.f32 %v1790_v53  ;;  %v2302_v53 = vld [vmem:[%s4137_s11] sm:$0xff] }
0x1fa2   :  { %v3223_v54 = vpop.eup %3222 }
0x1fa3   :  { %v1794_v58 = vmul.f32 %v3223_v54, %v1702_v41 }
0x2006   :  { %v1797_v55 = vpop.permute.xlu0 %1796 }
0x2007   :  { %v1799_v57 = vmul.f32 %v3223_v54, %v1797_v55 }
0x2009   :  { %1801 = vrot.lane.b32.xlu1 %v1799_v57, %s3472_s28 }
0x207b   :  { %v1802_v60 = vpop.permute.xlu1 %1801 }
0x207c   :  { %v1804_v45 = vadd.f32 %v1802_v60, %v1794_v58 }
0x207e   :  { %3224 = vtanh.f32 %v1804_v45 }
0x2088   :  { %v3225_v61 = vpop.eup %3224 }
0x2089   :  { %1807 = vrot.lane.b32.xlu0 %v3225_v61, %s3471_s5 }
0x20fb   :  { %v1808_v62 = vpop.permute.xlu0 %1807 }
0x20fc   :  { %v1810_v2 = vmul.f32 %v3223_v54, %v1808_v62  ;;  %v2303_v54 = vld [vmem:[%s4137_s11 + $0x8] sm:$0xff]  ;;  %v2304_v62 = vld [vmem:[%s4137_s11 + $0x10] sm:$0xff] }
0x20fd   :  { %v3073_v55 = vpack.c.bf16 %v2303_v54, %v2302_v53 }
0x20fe   :  { %1812 = vrot.lane.b32.xlu1 %v1810_v2, %s3472_s28  ;;  %v2305_v2 = vld [vmem:[%s4137_s11 + $0x18] sm:$0xff] }
0x2170   :  { %v1813_v3 = vpop.permute.xlu1 %1812 }
0x2171   :  { %1815 = vst.msk [vmem:[#allocation2 + $0x20] sm:$0xff] %vm296_vm3, %v1813_v3  ;;  %2873 = vmatmul.mubr.msk.f32.vlgmr.msra.gmra.mrb[12].mxu1 %vm296_vm3, %v1813_v3 }
0x2172   :  { %3061 = vmatpush3.bf16.msra.mxu1 %v3837_v56  ;;  %2894 = vmatprep.mubr.msk.f32.mxu1 %vm3469_vm0, %v3470_v1 }
0x2173   :  { %3062 = vmatprep.subr.bf16.mxu1 %v3468_v0 }
0x2176   :  { %3064 = vmatpush3.bf16.msra.mxu1 %v3841_v59 }
0x2177   :  { %3074 = vmatprep.subr.bf16.mxu1 %v3073_v55 }
0x2178   :  { %v2134_v26 = vld [vmem:[#allocation2 + $0x20] sm:$0xff] }
0x2244   :  { %v1885_v5 = vpop.f32.mrb[12].mxu1 }
0x2245   :  { %v1886_v7 = vadd.f32 %v1885_v5, %v1276_v4  ;;  %v2874_v8 = vpop.f32.mrb[13].mxu1  ;;  %v3077_v4 = vpack.c.bf16 %v2305_v2, %v2304_v62 }
0x2246   :  { %v2307_v8 = vld [vmem:[%s4137_s11 + $0x28] sm:$0xff] }
0x2247   :  { %3226 = vtanh.f32 %v1886_v7  ;;  %v2535_v10 = vmul.f32 -1.442695, %v1886_v7  ;;  %v2306_v7 = vld [vmem:[%s4137_s11 + $0x20] sm:$0xff] }
0x2249   :  { %3228 = vpow2.f32 %v2535_v10  ;;  %v3081_v10 = vpack.c.bf16 %v2307_v8, %v2306_v7 }
0x2251   :  { %v3227_v9 = vpop.eup %3226 }
0x2252   :  { %1898 = vrot.lane.b32.xlu0 %v3227_v9, %s3471_s5 }
0x2253   :  { %v3229_v56 = vpop.eup %3228 }
0x2254   :  { %v1892_v11 = vadd.f32 1.0, %v3229_v56  ;;  %v2308_v56 = vld [vmem:[%s4137_s11 + $0x30] sm:$0xff] }
0x2256   :  { %3230 = vrcp.f32 %v1892_v11  ;;  %v2309_v11 = vld [vmem:[%s4137_s11 + $0x38] sm:$0xff] }
0x2260   :  { %v3231_v1 = vpop.eup %3230 }
0x2261   :  { %v1896_v59 = vmul.f32 %v3231_v1, %v1804_v45  ;;  %v3995_v45 = vld [vmem:[%s4136_s10] ss:$0 sm:$0xff] }
0x22c4   :  { %v1899_v13 = vpop.permute.xlu0 %1898 }
0x22c5   :  { %v1901_v0 = vmul.f32 %v3231_v1, %v1899_v13 }
0x22c7   :  { %1903 = vrot.lane.b32.xlu1 %v1901_v0, %s3472_s28  ;;  %v2310_v0 = vld [vmem:[%s4137_s11 + $0x40] sm:$0xff] }
0x2339   :  { %v1904_v12 = vpop.permute.xlu1 %1903 }
0x233a   :  { %v1906_v44 = vadd.f32 %v1904_v12, %v1896_v59  ;;  %v2311_v59 = vld [vmem:[%s4137_s11 + $0x48] sm:$0xff] }
0x233b   :  { %v3089_v12 = vpack.c.bf16 %v2311_v59, %v2310_v0 }
0x233c   :  { %3232 = vtanh.f32 %v1906_v44 }
0x2346   :  { %v3233_v27 = vpop.eup %3232 }
0x2347   :  { %1909 = vrot.lane.b32.xlu0 %v3233_v27, %s3471_s5  ;;  %v2315_v27 = vld [vmem:[%s4137_s11 + $0x68] sm:$0xff] }
0x23b9   :  { %v1910_v16 = vpop.permute.xlu0 %1909 }
0x23ba   :  { %v1912_v43 = vmul.f32 %v3231_v1, %v1910_v16  ;;  %v3085_v1 = vpack.c.bf16 %v2309_v11, %v2308_v56 }
0x23bc   :  { %1914 = vrot.lane.b32.xlu1 %v1912_v43, %s3472_s28  ;;  %v2316_v43 = vld [vmem:[%s4137_s11 + $0x70] sm:$0xff] }
0x23bd   :  { %v3101_v18 = vpack.c.bf16 %v2317_v17, %v2316_v43 }
0x242e   :  { %v1915_v20 = vpop.permute.xlu1 %1914 }
0x242f   :  { %1917 = vst.msk [vmem:[#allocation2 + $0x28] sm:$0xff] %vm296_vm3, %v1915_v20  ;;  %2884 = vmatmul.mubr.msk.f32.vlgmr.msra.gmra.mrb[30].mxu0 %vm296_vm3, %v1915_v20 }
0x2430   :  { %3068 = vmatpush3.bf16.msra.mxu0 %v3065_v15  ;;  %2905 = vmatprep.mubr.msk.f32.mxu0 %vm296_vm3, %v2130_v21  ;;  %v2314_v15 = vld [vmem:[%s4137_s11 + $0x60] sm:$0xff] }
0x2431   :  { %3070 = vmatprep.subr.bf16.mxu0 %v3069_v19  ;;  %v3097_v16 = vpack.c.bf16 %v2315_v27, %v2314_v15 }
0x2434   :  { %3072 = vmatpush3.bf16.msra.mxu0 %v3069_v19 }
0x2436   :  { %v2135_v28 = vld [vmem:[#allocation2 + $0x28] sm:$0xff] }
0x2437   :  { %2906 = vmatmul.mubr.msk.f32.vlgmr.msra.gmra.mrb[32].mxu0 %vm296_vm3, %v2131_v22 }
0x2438   :  { %2908 = vmatprep.mubr.msk.f32.mxu0 %vm296_vm3, %v2132_v24 }
0x243b   :  { %2909 = vmatmul.mubr.msk.f32.gmra.mrb[34].mxu0 %vm296_vm3, %v2133_v25 }
0x243c   :  { %2911 = vmatprep.mubr.msk.f32.mxu0 %vm296_vm3, %v2134_v26 }
0x243f   :  { %2912 = vmatmul.mubr.msk.f32.gmra.mrb[36].mxu0 %vm296_vm3, %v2135_v28 }
0x2502   :  { %v1987_v32 = vpop.f32.mrb[30].mxu0 }
0x2503   :  { %v1988_v34 = vadd.f32 %v1987_v32, %v1281_v30  ;;  %v2885_v35 = vpop.f32.mrb[31].mxu0 }
0x2505   :  { %3234 = vtanh.f32 %v1988_v34  ;;  %v2537_v33 = vmul.f32 -1.442695, %v1988_v34 }
0x2507   :  { %3236 = vpow2.f32 %v2537_v33 }
0x250a   :  { %v3969_v36 = vpop.f32.mrb[32].mxu0 }
0x250b   :  { %v2239_v37 = vpop.f32.mrb[33].mxu0  ;;  %v2245_v19 = vadd.f32 %v3969_v36, %v3995_v45 }
0x250c   :  { %v2240_v61 = vadd.f32 %v3995_v45, %v2239_v37 }
0x250d   :  { %v2287_v21 = vmul.f32 0.01, %v2245_v19  ;;  %vm2279_vm5 = vcmp.ge.f32.partialorder %v2245_v19, 0.0 }
0x250e   :  { %v3971_v40 = vpop.f32.mrb[34].mxu0  ;;  %v2286_v3 = vmul.f32 0.01, %v2240_v61  ;;  %vm2278_vm4 = vcmp.ge.f32.partialorder %v2240_v61, 0.0 }
0x250f   :  { %v3235_v41 = vpop.eup %3234  ;;  %v3973_v42 = vpop.f32.mrb[35].mxu0  ;;  %v2255_v22 = vadd.f32 %v3971_v40, %v3995_v45  ;;  %v2295_v30 = vsel %vm2279_vm5, %v2245_v19, %v2287_v21 }
0x2510   :  { %2000 = vrot.lane.b32.xlu0 %v3235_v41, %s3471_s5  ;;  %v2294_v9 = vsel %vm2278_vm4, %v2240_v61, %v2286_v3  ;;  %v2250_v20 = vadd.f32 %v3995_v45, %v3973_v42  ;;  %v1286_v41 = vadd.f32 %v3899_v29, %v3867_v6 }
0x2511   :  { %v3237_v63 = vpop.eup %3236  ;;  %v2289_v26 = vmul.f32 0.01, %v2255_v22  ;;  %vm2281_vm7 = vcmp.ge.f32.partialorder %v2255_v22, 0.0 }
0x2512   :  { %v3976_v23 = vpop.f32.mrb[36].mxu0  ;;  %v1994_v47 = vadd.f32 1.0, %v3237_v63  ;;  %v2288_v24 = vmul.f32 0.01, %v2250_v20  ;;  %vm2280_vm6 = vcmp.ge.f32.partialorder %v2250_v20, 0.0 }
0x2513   :  { %v3978_v46 = vpop.f32.mrb[37].mxu0  ;;  %v2265_v28 = vadd.f32 %v3976_v23, %v3995_v45  ;;  %v2297_v36 = vsel %vm2281_vm7, %v2255_v22, %v2289_v26  ;;  %v4059_v63 = vld [vmem:[%s4138_s12] ss:$0 sm:$0xff]  ;;  %s3473_s12 = smov 96  }
0x2514   :  { %3238 = vrcp.f32 %v1994_v47  ;;  %v2260_v25 = vadd.f32 %v3995_v45, %v3978_v46  ;;  %v2296_v34 = vsel %vm2280_vm6, %v2250_v20, %v2288_v24 }
0x2515   :  { %v2291_v35 = vmul.f32 0.01, %v2265_v28  ;;  %vm2283_vm9 = vcmp.ge.f32.partialorder %v2265_v28, 0.0 }
0x2516   :  { %v2290_v32 = vmul.f32 0.01, %v2260_v25  ;;  %vm2282_vm8 = vcmp.ge.f32.partialorder %v2260_v25, 0.0 }
0x2517   :  { %v2299_v40 = vsel %vm2283_vm9, %v2265_v28, %v2291_v35 }
0x2518   :  { %v2298_v37 = vsel %vm2282_vm8, %v2260_v25, %v2290_v32 }
0x251e   :  { %v3239_v48 = vpop.eup %3238 }
0x251f   :  { %v1998_v51 = vmul.f32 %v3239_v48, %v1906_v44  ;;  %v2312_v44 = vld [vmem:[%s4137_s11 + $0x50] sm:$0xff] }
0x2520   :  { %v3093_v31 = vpack.c.bf16 %v2313_v14, %v2312_v44 }
0x2582   :  { %v2001_v49 = vpop.permute.xlu0 %2000 }
0x2583   :  { %v2003_v50 = vmul.f32 %v3239_v48, %v2001_v49 }
0x2585   :  { %2005 = vrot.lane.b32.xlu1 %v2003_v50, %s3472_s28 }
0x25f7   :  { %v2006_v52 = vpop.permute.xlu1 %2005 }
0x25f8   :  { %v3981_v39 = vadd.f32 %v2006_v52, %v1998_v51 }
0x25fa   :  { %3240 = vtanh.f32 %v3981_v39 }
0x2604   :  { %v3241_v57 = vpop.eup %3240 }
0x2605   :  { %2011 = vrot.lane.b32.xlu0 %v3241_v57, %s3471_s5 }
0x2677   :  { %v2012_v58 = vpop.permute.xlu0 %2011 }
0x2678   :  { %v2014_v60 = vmul.f32 %v3239_v48, %v2012_v58 }
0x267a   :  { %2016 = vrot.lane.b32.xlu1 %v2014_v60, %s3472_s28 }
0x26ec   :  { %v2017_v5 = vpop.permute.xlu1 %2016 }
0x26ed   :  { %2019 = vst.msk [vmem:[#allocation2 + $0x30] sm:$0xff] %vm296_vm3, %v2017_v5  ;;  %2895 = vmatmul.mubr.msk.f32.vlgmr.msra.gmra.mrb[14].mxu1 %vm296_vm3, %v2017_v5 }
0x26ee   :  { %3076 = vmatpush3.bf16.msra.mxu1 %v3073_v55  ;;  %2949 = vmatprep.mubr.f32.mxu1 %v2294_v9 }
0x26ef   :  { %3078 = vmatprep.subr.bf16.mxu1 %v3077_v4 }
0x26f2   :  { %3080 = vmatpush3.bf16.msra.mxu1 %v3077_v4 }
0x26f3   :  { %3082 = vmatprep.subr.bf16.mxu1 %v3081_v10 }
0x26f4   :  { %v2136_v13 = vld [vmem:[#allocation2 + $0x30] sm:$0xff] }
0x26f5   :  { %2914 = vmatprep.mubr.msk.f32.mxu0 %vm296_vm3, %v2136_v13 }
0x26f6   :  { %3084 = vmatpush3.bf16.msra.mxu1 %v3081_v10 }
0x26f7   :  { %3086 = vmatprep.subr.bf16.mxu1 %v3085_v1 }
0x26fa   :  { %3088 = vmatpush3.bf16.msra.mxu1 %v3085_v1 }
0x26fb   :  { %3090 = vmatprep.subr.bf16.mxu1 %v3089_v12 }
0x26fe   :  { %3092 = vmatpush3.bf16.msra.mxu1 %v3089_v12 }
0x26ff   :  { %3094 = vmatprep.subr.bf16.mxu1 %v3093_v31 }
0x2702   :  { %3096 = vmatpush3.bf16.msra.mxu1 %v3093_v31 }
0x2703   :  { %3098 = vmatprep.subr.bf16.mxu1 %v3097_v16 }
0x2706   :  { %3100 = vmatpush3.bf16.msra.mxu1 %v3097_v16 }
0x2707   :  { %3102 = vmatprep.subr.bf16.mxu1 %v3101_v18 }
0x270a   :  { %3104 = vmatpush3.bf16.msra.mxu1 %v3101_v18 }
0x270d   :  { %2950 = vmatmul.mubr.f32.vlgmr.msra.gmra.mrb[16].mxu1 %v2295_v30 }
0x270e   :  { %2952 = vmatprep.mubr.f32.mxu1 %v2296_v34 }
0x2711   :  { %2953 = vmatmul.mubr.f32.gmra.mrb[18].mxu1 %v2297_v36 }
0x2712   :  { %2955 = vmatprep.mubr.f32.mxu1 %v2298_v37 }
0x2715   :  { %2956 = vmatmul.mubr.f32.gmra.mrb[20].mxu1 %v2299_v40 }
0x27c0   :  { %v2089_v42 = vpop.f32.mrb[14].mxu1 }
0x27c1   :  { %v2090_v23 = vadd.f32 %v2089_v42, %v1286_v41  ;;  %v2896_v46 = vpop.f32.mrb[15].mxu1 }
0x27c3   :  { %3242 = vtanh.f32 %v2090_v23  ;;  %v2539_v58 = vmul.f32 -1.442695, %v2090_v23 }
0x27c5   :  { %3244 = vpow2.f32 %v2539_v58 }
0x27cd   :  { %v3243_v33 = vpop.eup %3242 }
0x27ce   :  { %2102 = vrot.lane.b32.xlu0 %v3243_v33, %s3471_s5 }
0x27cf   :  { %v3245_v60 = vpop.eup %3244 }
0x27d0   :  { %v2096_v61 = vadd.f32 1.0, %v3245_v60 }
0x27d2   :  { %3246 = vrcp.f32 %v2096_v61 }
0x27dc   :  { %v3247_v62 = vpop.eup %3246 }
0x27dd   :  { %v2100_v4 = vmul.f32 %v3247_v62, %v3981_v39 }
0x27e0   :  { %v2951_v47 = vpop.f32.mrb[16].mxu1 }
0x27e1   :  { %v2397_v48 = vadd.f32 %v2951_v47, %v4059_v63  ;;  %v2391_v49 = vpop.f32.mrb[17].mxu1 }
0x27e2   :  { %v2392_v50 = vadd.f32 %v4059_v63, %v2391_v49 }
0x27e3   :  { %2431 = vst [vmem:[#allocation15 + $0x8] sm:$0xff] %v2397_v48 }
0x27e4   :  { %2430 = vst [vmem:[#allocation15] sm:$0xff] %v2392_v50  ;;  %v2954_v6 = vpop.f32.mrb[18].mxu1 }
0x27e5   :  { %v2407_v29 = vadd.f32 %v2954_v6, %v4059_v63  ;;  %v2401_v51 = vpop.f32.mrb[19].mxu1 }
0x27e6   :  { %v2402_v52 = vadd.f32 %v4059_v63, %v2401_v51 }
0x27e7   :  { %2433 = vst [vmem:[#allocation15 + $0x18] sm:$0xff] %v2407_v29 }
0x27e8   :  { %2432 = vst [vmem:[#allocation15 + $0x10] sm:$0xff] %v2402_v52  ;;  %v2957_v53 = vpop.f32.mrb[20].mxu1 }
0x27e9   :  { %v2417_v54 = vadd.f32 %v2957_v53, %v4059_v63  ;;  %v2411_v55 = vpop.f32.mrb[21].mxu1 }
0x27ea   :  { %v2412_v57 = vadd.f32 %v4059_v63, %v2411_v55 }
0x27eb   :  { %2435 = vst [vmem:[#allocation15 + $0x28] sm:$0xff] %v2417_v54 }
0x27ec   :  { %2434 = vst [vmem:[#allocation15 + $0x20] sm:$0xff] %v2412_v57 }
0x2840   :  { %v2103_v2 = vpop.permute.xlu0 %2102 }
0x2841   :  { %v2105_v3 = vmul.f32 %v3247_v62, %v2103_v2 }
0x2843   :  { %2107 = vrot.lane.b32.xlu1 %v2105_v3, %s3472_s28 }
0x28b5   :  { %v2108_v5 = vpop.permute.xlu1 %2107 }
0x28b6   :  { %v2110_v7 = vadd.f32 %v2108_v5, %v2100_v4 }
0x28b8   :  { %3248 = vtanh.f32 %v2110_v7 }
0x28c2   :  { %v3249_v8 = vpop.eup %3248 }
0x28c3   :  { %2113 = vrot.lane.b32.xlu0 %v3249_v8, %s3471_s5  ;;  %s3474_s5 = smov [#allocation16]  }
0x28c7   :  { %1133 = vrot.lane.b32.xlu0 %v3883_v38, %s3473_s12 }
0x2935   :  { %v2114_v9 = vpop.permute.xlu0 %2113 }
0x2936   :  { %v2116_v10 = vmul.f32 %v3247_v62, %v2114_v9 }
0x2938   :  { %2118 = vrot.lane.b32.xlu1 %v2116_v10, %s3472_s28  ;;  %s2455_s28 = sshll.u32 %s3474_s5, 4  ;;  %s2456_s28 = int_to_ptr.vmem [resolvable:$true] %s2455_s28 }
0x2939   :  { %v1134_v56 = vpop.permute.xlu0 %1133  ;;  %s3382_s27 = scalar_lea.vmem %s2456_s28, 256  ;;  %p3387_p7 = scmp.lt.s32.totalorder %s2456_s28, %s2456_s28 }
0x293a   :  { %1136 = vst.msk [vmem:[#allocation18] sm:$0xff] %vm296_vm3, %v1134_v56  ;;  %p3383_p6 = scmp.ne.s32.totalorder %s2456_s28, %s3382_s27  ;;  %p3388_p8 = scmp.lt.s32.totalorder %s3382_s27, %s3382_s27 }
0x293c   :  { %2125 = vrot.lane.b32.xlu1 %v2110_v7, %s3473_s12  ;;  %p3389_p9 = por %p3388_p8, %p3387_p7 }
0x293e   :  { %p3390_p10 = pnand %p3389_p9, %p3383_p6 }
0x29aa   :  { %v2119_v11 = vpop.permute.xlu1 %2118 }
0x29ab   :  { %2121 = vst.msk [vmem:[#allocation2 + $0x38] sm:$0xff] %vm296_vm3, %v2119_v11  ;;  %2123 = vst.msk [vmem:[#allocation16 + $0x8] sm:$0xff] %vm296_vm3, %v2119_v11 }
0x29ae   :  { %v2126_v39 = vpop.permute.xlu1 %2125 }
0x29af   :  { %2129 = vst.msk [vmem:[#allocation18 + $0x8] sm:$0xff] %vm296_vm3, %v2126_v39 }
0x29b2   :  { %v2137_v1 = vld [vmem:[#allocation2 + $0x38] sm:$0xff] }
0x29b3   :  { %2915 = vmatmul.mubr.msk.f32.gmra.mrb[38].mxu0 %vm296_vm3, %v2137_v1 }
0x2a86   :  { %v2916_v38 = vpop.f32.mrb[38].mxu0 }
0x2a87   :  { %v2275_v13 = vadd.f32 %v2916_v38, %v3995_v45  ;;  %v2269_v0 = vpop.f32.mrb[39].mxu0 }
0x2a88   :  { %v2270_v59 = vadd.f32 %v3995_v45, %v2269_v0 }
0x2a89   :  { %v2293_v12 = vmul.f32 0.01, %v2275_v13  ;;  %vm2285_vm11 = vcmp.ge.f32.partialorder %v2275_v13, 0.0 }
0x2a8a   :  { %v2292_v44 = vmul.f32 0.01, %v2270_v59  ;;  %vm2284_vm10 = vcmp.ge.f32.partialorder %v2270_v59, 0.0 }
0x2a8b   :  { %v2301_v31 = vsel %vm2285_vm11, %v2275_v13, %v2293_v12 }
0x2a8c   :  { %v2300_v14 = vsel %vm2284_vm10, %v2270_v59, %v2292_v44 }
0x2a8d   :  { %2958 = vmatprep.mubr.f32.mxu1 %v2300_v14 }
0x2a8e   :  { %2959 = vmatmul.mubr.f32.gmra.mrb[22].mxu1 %v2301_v31 }
0x2a8f   :  { %3393 = shalt.err (!%p3390_p10)
}
0x2a90   :  { %s3394_s19 = scalar_lea.hbm %s4140_s14, 256 }
0x2a91   :  { %p3395_p11 = scmp.ne.s32.totalorder %s4140_s14, %s3394_s19  ;;  %p3398_p12 = scmp.lt.u32.totalorder %s3394_s19, %s4140_s14 }
0x2a93   :  { %p3400_p13 = pnand %p3398_p12, %p3395_p11 }
0x2a95   :  { %3403 = shalt.err (!%p3400_p13)
}
0x2a96   :  { %2461 = dma.vmem_to_hbm [thread:$0]  %s2456_s28, 256, %s4140_s14, [#allocation17], %s3462_s30, %s3462_s30, %s3463_s16  }
0x2a97   :  { %s3475_s21 = smov [#allocation18]  }
0x2a98   :  { %s2467_s22 = sshll.u32 %s3475_s21, 4  ;;  %s2468_s22 = int_to_ptr.vmem [resolvable:$true] %s2467_s22 }
0x2a99   :  { %s3404_s23 = scalar_lea.vmem %s2468_s22, 256  ;;  %p3409_p1 = scmp.lt.s32.totalorder %s2468_s22, %s2468_s22 }
0x2a9a   :  { %p3405_p0 = scmp.ne.s32.totalorder %s2468_s22, %s3404_s23  ;;  %p3410_p2 = scmp.lt.s32.totalorder %s3404_s23, %s3404_s23 }
0x2a9c   :  { %p3411_p3 = por %p3410_p2, %p3409_p1 }
0x2a9e   :  { %p3412_p4 = pnand %p3411_p3, %p3405_p0 }
0x2aa0   :  { %3415 = shalt.err (!%p3412_p4)
}
0x2aa1   :  { %s3416_s20 = scalar_lea.hbm %s4141_s15, 256 }
0x2aa2   :  { %p3417_p5 = scmp.ne.s32.totalorder %s4141_s15, %s3416_s20  ;;  %p3420_p6 = scmp.lt.u32.totalorder %s3416_s20, %s4141_s15 }
0x2aa4   :  { %p3422_p7 = pnand %p3420_p6, %p3417_p5 }
0x2aa6   :  { %3425 = shalt.err (!%p3422_p7)
}
0x2aa7   :  { %2473 = dma.vmem_to_hbm [thread:$0]  %s2468_s22, 256, %s4141_s15, [#allocation17], %s3462_s30, %s3462_s30, %s3463_s16  }
0x2aa8   :  { %s3476_s11 = smov [#allocation15]  }
0x2aa9   :  { %s2443_s10 = sshll.u32 %s3476_s11, 4  ;;  %s2444_s10 = int_to_ptr.vmem [resolvable:$true] %s2443_s10 }
0x2aaa   :  { %s3426_s12 = scalar_lea.vmem %s2444_s10, 1024  ;;  %p3431_p9 = scmp.lt.s32.totalorder %s2444_s10, %s2444_s10 }
0x2aab   :  { %p3427_p8 = scmp.ne.s32.totalorder %s2444_s10, %s3426_s12  ;;  %p3432_p10 = scmp.lt.s32.totalorder %s3426_s12, %s3426_s12 }
0x2aad   :  { %p3433_p11 = por %p3432_p10, %p3431_p9 }
0x2aaf   :  { %p3434_p12 = pnand %p3433_p11, %p3427_p8 }
0x2b61   :  { %v2960_v45 = vpop.f32.mrb[22].mxu1 }
0x2b62   :  { %v2427_v15 = vadd.f32 %v2960_v45, %v4059_v63  ;;  %v2421_v27 = vpop.f32.mrb[23].mxu1 }
0x2b63   :  { %v2422_v16 = vadd.f32 %v4059_v63, %v2421_v27 }
0x2b64   :  { %2437 = vst [vmem:[#allocation15 + $0x38] sm:$0xff] %v2427_v15 }
0x2b65   :  { %2436 = vst [vmem:[#allocation15 + $0x30] sm:$0xff] %v2422_v16 }
0x2b66   :  { %3437 = shalt.err (!%p3434_p12)
}
0x2b67   :  { %s3438_s28 = scalar_lea.hbm %s4139_s13, 1024 }
0x2b68   :  { %p3439_p13 = scmp.ne.s32.totalorder %s4139_s13, %s3438_s28  ;;  %p3442_p0 = scmp.lt.u32.totalorder %s3438_s28, %s4139_s13 }
0x2b6a   :  { %p3444_p1 = pnand %p3442_p0, %p3439_p13 }
0x2b6c   :  { %3447 = shalt.err (!%p3444_p1)
}
0x2b6d   :  { %2449 = dma.vmem_to_hbm [thread:$0]  %s2444_s10, 1024, %s4139_s13, [#allocation6], %s3462_s30, %s3462_s30, %s3463_s16  }
0x2b6e   :  { %3456 = dma.done.wait [#allocation6], 1024  }
0x2b6f   :  { %3457 = vsyncadd [#allocation6], 4294966272 }
0x2b70   :  { %3458 = dma.done.wait [#allocation17], 512  }
0x2b71   :  { %3459 = vsyncadd [#allocation17], 4294966784 }
0x2b72   :  { %2483 = vsyncpa [#allocation5], 1 }
0x2b73   :  { %2484 = vsyncpa [#allocation8], 1 }
0x2b74   :  { %2485 = vsyncpa [#allocation11], 1 }
0x2b75   :  { %2486 = vsyncpa [#allocation14], 1 }
0x2b76   :  { %2487 = vsyncpa [#allocation6], 1 }
0x2b77   :  { %2488 = vsyncpa [#allocation17], 1 }

</bundles_post_ra>
